<compile_context>
chip_gen: v6e
topology: v6e:2x2x1
jax: 0.10.0
libtpu: 0.0.40
codegen_flags: <defaults>
</compile_context>

<pallas_src>
import functools

import jax
import jax.numpy as jnp
from jax.experimental import pallas as pl
from jax.experimental.pallas import tpu as pltpu


def _sigmoid(v):
    return 1.0 / (1.0 + jnp.exp(-v))


# ------------------------------ Pallas kernels -------------------------------

def conv_stage_kernel(x_ref, w_ref, b_ref, scale_ref, shift_ref,
                      y_ref, stats_ref, pad_ref, *, H, W, apply_act):
    """Fused [prev BN + swish] -> 3x3 stride-2 conv -> bias -> per-channel stats.

    x_ref:     (1, H, W, Cin)     input tile (one image, NHWC)
    w_ref:     (9*Cin, Cout)      weights, row = (kh*3+kw)*Cin + cin
    b_ref:     (1, Cout)
    scale_ref: (1, Cin)           folded BN scale of the previous stage
    shift_ref: (1, Cin)           folded BN shift of the previous stage
    y_ref:     (1, Ho*Wo, Cout)   pre-BN conv output of this stage
    stats_ref: (1, 2, Cout)       per-image [sum, sum_sq] per output channel
    pad_ref:   (H+2, W+2, Cin)    VMEM scratch holding the zero-padded input
    """
    Cin = x_ref.shape[3]
    Ho, Wo = H // 2, W // 2

    x = x_ref[0]                                          # (H, W, Cin)
    if apply_act:
        # Previous stage's BatchNorm (batch statistics) + swish, fused here so
        # the normalized activation never touches HBM.
        z = x * scale_ref[...] + shift_ref[...]
        x = z * _sigmoid(z)

    # Build the 1-pixel zero halo in VMEM (no jnp.pad HBM round trip).
    pad_ref[...] = jnp.zeros_like(pad_ref)
    pad_ref[1:H + 1, 1:W + 1, :] = x

    # im2col: the 9 stride-2 tap windows concatenated along channels
    # -> one (Ho*Wo, 9*Cin) matrix and a single MXU matmul with K = 9*Cin.
    taps = []
    for kh in range(3):
        for kw in range(3):
            win = pad_ref[pl.ds(kh, Ho, stride=2), pl.ds(kw, Wo, stride=2), :]
            taps.append(win.reshape(Ho * Wo, Cin))
    patches = jnp.concatenate(taps, axis=1)               # (Ho*Wo, 9*Cin)

    acc = jnp.dot(patches, w_ref[...], preferred_element_type=jnp.float32)
    acc = acc + b_ref[...]                                 # (Ho*Wo, Cout)
    y_ref[0] = acc

    # Per-image, per-channel statistics for this stage's (training-mode)
    # BatchNorm -- emitted here so the batch-stat reduction never re-reads the
    # conv output from HBM.
    stats_ref[0, 0:1, :] = jnp.sum(acc, axis=0, keepdims=True)
    stats_ref[0, 1:2, :] = jnp.sum(acc * acc, axis=0, keepdims=True)


def head_kernel(x_ref, scale_ref, shift_ref, w_ref, b_ref, o_ref, *, S):
    """Fused swish(bn6(.)) -> 1x1 conv9 (padding=1) -> global avg pool -> sigmoid.

    x_ref: (1, S*S, C)  pre-BN conv6 output of one image
    scale_ref/shift_ref: (1, C)   folded bn6 scale/shift
    w_ref: (1, C)   conv9 weight (Cout=1);  b_ref: (1, 1)
    o_ref: (1, 1, 1)
    """
    x = x_ref[0]                                           # (S*S, C)
    z = x * scale_ref[...] + shift_ref[...]
    a = z * _sigmoid(z)                                    # swish
    s = jnp.sum(a, axis=0, keepdims=True)                  # (1, C)
    # conv9 is 1x1 with padding=1 -> output is (S+2)x(S+2); the padded border
    # contributes only the bias, so:
    #   mean(conv9) = (w9 . sum_spatial(a)) / (S+2)^2 + b9
    so2 = float((S + 2) * (S + 2))
    logit = jnp.sum(s * w_ref[...], axis=1, keepdims=True) / so2 + b_ref[...]
    o_ref[0] = _sigmoid(logit)


# --------------------------------- Wrappers ----------------------------------

def conv_stage(x, w, b, scale, shift, *, apply_act):
    """One Discriminator stage. x: (N,H,W,Cin) NHWC; w: (Cout,Cin,3,3) OIHW."""
    N, H, W, Cin = x.shape
    assert H % 2 == 0 and W % 2 == 0
    Cout = w.shape[0]
    Ho, Wo = H // 2, W // 2
    # (Cout,Cin,3,3) -> (3,3,Cin,Cout) -> (9*Cin,Cout); row = (kh*3+kw)*Cin+cin.
    w_mat = jnp.transpose(w, (2, 3, 1, 0)).reshape(9 * Cin, Cout)
    kernel = functools.partial(conv_stage_kernel, H=H, W=W, apply_act=apply_act)
    y, stats = pl.pallas_call(
        kernel,
        out_shape=(
            jax.ShapeDtypeStruct((N, Ho * Wo, Cout), jnp.float32),
            jax.ShapeDtypeStruct((N, 2, Cout), jnp.float32),
        ),
        grid=(N,),
        in_specs=[
            pl.BlockSpec((1, H, W, Cin), lambda n: (n, 0, 0, 0)),
            pl.BlockSpec((9 * Cin, Cout), lambda n: (0, 0)),
            pl.BlockSpec((1, Cout), lambda n: (0, 0)),
            pl.BlockSpec((1, Cin), lambda n: (0, 0)),
            pl.BlockSpec((1, Cin), lambda n: (0, 0)),
        ],
        out_specs=(
            pl.BlockSpec((1, Ho * Wo, Cout), lambda n: (n, 0, 0)),
            pl.BlockSpec((1, 2, Cout), lambda n: (n, 0, 0)),
        ),
        scratch_shapes=[pltpu.VMEM((H + 2, W + 2, Cin), jnp.float32)],
        compiler_params=pltpu.CompilerParams(dimension_semantics=("parallel",)),
    )(x, w_mat, b.reshape(1, Cout), scale.reshape(1, Cin), shift.reshape(1, Cin))
    return y, stats


def head_stage(y3, scale, shift, w9, b9, *, S):
    N, SS, C = y3.shape
    kernel = functools.partial(head_kernel, S=S)
    out = pl.pallas_call(
        kernel,
        out_shape=jax.ShapeDtypeStruct((N, 1, 1), jnp.float32),
        grid=(N,),
        in_specs=[
            pl.BlockSpec((1, SS, C), lambda n: (n, 0, 0)),
            pl.BlockSpec((1, C), lambda n: (0, 0)),
            pl.BlockSpec((1, C), lambda n: (0, 0)),
            pl.BlockSpec((1, C), lambda n: (0, 0)),
            pl.BlockSpec((1, 1), lambda n: (0, 0)),
        ],
        out_specs=pl.BlockSpec((1, 1, 1), lambda n: (n, 0, 0)),
        compiler_params=pltpu.CompilerParams(dimension_semantics=("parallel",)),
    )(y3, scale.reshape(1, C), shift.reshape(1, C), w9.reshape(1, C),
      b9.reshape(1, 1))
    return out.reshape(N, 1)


def _bn_fold(stats, count, gamma, beta, eps):
    """Fold training-mode BatchNorm (batch stats) into per-channel scale/shift.

    stats: (N, 2, C) per-image [sum, sum_sq] emitted by the conv kernel.
    Tiny per-channel glue (a few hundred floats).
    """
    total = jnp.sum(stats[:, 0, :], axis=0)
    total_sq = jnp.sum(stats[:, 1, :], axis=0)
    mean = total / count
    # one-pass (sum, sum_sq) variance; clamp guards tiny negatives from
    # cancellation (activations are O(1) here, well inside tolerance).
    var = jnp.maximum(total_sq / count - mean * mean, 0.0)
    scale = gamma / jnp.sqrt(var + eps)
    shift = beta - mean * scale
    return scale, shift


@jax.jit
def discriminator_forward(x_nchw, params, eps=1e-5):
    N, _, H, W = x_nchw.shape
    # Only boundary transpose: tiny raw input NCHW -> NHWC; all intermediate
    # activations stay in the kernels' NHWC-flat layout between stages.
    x = jnp.transpose(x_nchw, (0, 2, 3, 1))

    # conv2 (3->32, stride 2): raw input, no pre-activation.
    dummy = jnp.zeros((x.shape[3],), jnp.float32)
    y1, st1 = conv_stage(x, params["w2"], params["b2"], dummy, dummy,
                         apply_act=False)
    H1, W1 = H // 2, W // 2
    sc1, sh1 = _bn_fold(st1, N * H1 * W1, params["g2"], params["be2"], eps)

    # swish(bn2(.)) fused into conv4 (32->64, stride 2).
    y2, st2 = conv_stage(y1.reshape(N, H1, W1, -1), params["w4"], params["b4"],
                         sc1, sh1, apply_act=True)
    H2, W2 = H1 // 2, W1 // 2
    sc2, sh2 = _bn_fold(st2, N * H2 * W2, params["g4"], params["be4"], eps)

    # swish(bn4(.)) fused into conv6 (64->128, stride 2).
    y3, st3 = conv_stage(y2.reshape(N, H2, W2, -1), params["w6"], params["b6"],
                         sc2, sh2, apply_act=True)
    H3, W3 = H2 // 2, W2 // 2
    sc3, sh3 = _bn_fold(st3, N * H3 * W3, params["g6"], params["be6"], eps)

    # Head: swish(bn6(.)) + conv9 (1x1, padding 1) + global avg pool + sigmoid.
    return head_stage(y3, sc3, sh3, params["w9"], params["b9"], S=H3)


# ----------------------------- Pure-JAX reference ----------------------------

@jax.jit
def reference_forward(x_nchw, params, eps=1e-5):
    hi = jax.lax.Precision.HIGHEST

    def conv(x, w, b, stride, pad):
        y = jax.lax.conv_general_dilated(
            x, w, window_strides=(stride, stride),
            padding=((pad, pad), (pad, pad)),
            dimension_numbers=("NCHW", "OIHW", "NCHW"), precision=hi)
        return y + b.reshape(1, -1, 1, 1)

    def bn_train(x, g, bta):
        m = jnp.mean(x, axis=(0, 2, 3), keepdims=True)
        v = jnp.mean(jnp.square(x - m), axis=(0, 2, 3), keepdims=True)
        return ((x - m) / jnp.sqrt(v + eps) * g.reshape(1, -1, 1, 1)
                + bta.reshape(1, -1, 1, 1))

    def swish(x):
        return x * _sigmoid(x)

    x = swish(bn_train(conv(x_nchw, params["w2"], params["b2"], 2, 1),
                       params["g2"], params["be2"]))
    x = swish(bn_train(conv(x, params["w4"], params["b4"], 2, 1),
                       params["g4"], params["be4"]))
    x = swish(bn_train(conv(x, params["w6"], params["b6"], 2, 1),
                       params["g6"], params["be6"]))
    x = conv(x, params["w9"], params["b9"], 1, 1)
    pooled = jnp.mean(x, axis=(2, 3)).reshape(x.shape[0], -1)   # (N, 1)
    return _sigmoid(pooled)


# ------------------------------------ main -----------------------------------

if __name__ == "__main__":
    N, H, W = 2, 16, 16

    key = jax.random.PRNGKey(0)
    ks = jax.random.split(key, 15)

    def nrm(k, shape, s=0.1):
        return s * jax.random.normal(k, shape, jnp.float32)

    params = {
        "w2": nrm(ks[0], (32, 3, 3, 3)),    "b2": nrm(ks[1], (32,), 0.05),
        "g2": 1.0 + nrm(ks[2], (32,)),      "be2": nrm(ks[3], (32,)),
        "w4": nrm(ks[4], (64, 32, 3, 3)),   "b4": nrm(ks[5], (64,), 0.05),
        "g4": 1.0 + nrm(ks[6], (64,)),      "be4": nrm(ks[7], (64,)),
        "w6": nrm(ks[8], (128, 64, 3, 3)),  "b6": nrm(ks[9], (128,), 0.05),
        "g6": 1.0 + nrm(ks[10], (128,)),    "be6": nrm(ks[11], (128,)),
        "w9": nrm(ks[12], (1, 128, 1, 1)),  "b9": nrm(ks[13], (1,), 0.05),
    }
    x = jax.random.normal(ks[14], (N, 3, H, W), jnp.float32)   # NCHW like PyTorch

    out = jax.block_until_ready(discriminator_forward(x, params))
    ref = jax.block_until_ready(reference_forward(x, params))

    assert out.shape == (N, 1), out.shape
    max_err = float(jnp.max(jnp.abs(out - ref)))
    assert jnp.allclose(out, ref, atol=2e-4, rtol=2e-4), max_err
    print("KERNEL_OK")
</pallas_src>

<mosaic_0001>
module attributes {stable_mosaic.version = 11 : i64} {
  func.func @conv_stage_kernel(%arg0: i32, %arg1: memref<1x16x16x3xf32, #tpu.memory_space<vmem>>, %arg2: memref<27x32xf32, #tpu.memory_space<vmem>>, %arg3: memref<1x32xf32, #tpu.memory_space<vmem>>, %arg4: memref<1x3xf32, #tpu.memory_space<vmem>>, %arg5: memref<1x3xf32, #tpu.memory_space<vmem>>, %arg6: memref<1x64x32xf32, #tpu.memory_space<vmem>>, %arg7: memref<1x2x32xf32, #tpu.memory_space<vmem>>, %arg8: memref<18x18x3xf32, #tpu.memory_space<vmem>>) attributes {dimension_semantics = [#tpu.dimension_semantics<parallel>], iteration_bounds = array<i64: 2>, scalar_prefetch = 0 : i64, scratch_operands = 1 : i64, tpu.core_type = #tpu.core_type<tc>, window_params = [{transform_indices = @transform_0, window_bounds = array<i64: 1, 16, 16, 3>}, {pipeline_mode = #tpu.pipeline_mode<synchronous>, transform_indices = @transform_1, window_bounds = array<i64: 27, 32>}, {pipeline_mode = #tpu.pipeline_mode<synchronous>, transform_indices = @transform_2, window_bounds = array<i64: 1, 32>}, {pipeline_mode = #tpu.pipeline_mode<synchronous>, transform_indices = @transform_3, window_bounds = array<i64: 1, 3>}, {pipeline_mode = #tpu.pipeline_mode<synchronous>, transform_indices = @transform_4, window_bounds = array<i64: 1, 3>}, {transform_indices = @transform_5, window_bounds = array<i64: 1, 64, 32>}, {transform_indices = @transform_6, window_bounds = array<i64: 1, 2, 32>}]} {
    %c0 = arith.constant 0 : index
    %c0_0 = arith.constant 0 : index
    %c0_1 = arith.constant 0 : index
    %c0_2 = arith.constant 0 : index
    %0 = vector.load %arg1[%c0, %c0_0, %c0_1, %c0_2] : memref<1x16x16x3xf32, #tpu.memory_space<vmem>>, vector<1x16x16x3xf32>
    %1 = vector.shape_cast %0 : vector<1x16x16x3xf32> to vector<16x16x3xf32>
    %cst = arith.constant 0.000000e+00 : f32
    %2 = vector.broadcast %cst : f32 to vector<18x18x3xf32>
    %c0_3 = arith.constant 0 : index
    %c0_4 = arith.constant 0 : index
    %c0_5 = arith.constant 0 : index
    %3 = vector.load %arg8[%c0_3, %c0_4, %c0_5] : memref<18x18x3xf32, #tpu.memory_space<vmem>>, vector<18x18x3xf32>
    tpu.vector_store %arg8[%c0_3, %c0_4, %c0_5], %2 {strides = array<i32>} : memref<18x18x3xf32, #tpu.memory_space<vmem>>, vector<18x18x3xf32>,
    %c1 = arith.constant 1 : index
    %c1_6 = arith.constant 1 : index
    %c0_7 = arith.constant 0 : index
    %4 = vector.load %arg8[%c1, %c1_6, %c0_7] : memref<18x18x3xf32, #tpu.memory_space<vmem>>, vector<16x16x3xf32>
    tpu.vector_store %arg8[%c1, %c1_6, %c0_7], %1 {strides = array<i32>} : memref<18x18x3xf32, #tpu.memory_space<vmem>>, vector<16x16x3xf32>,
    %c0_8 = arith.constant 0 : index
    %c0_9 = arith.constant 0 : index
    %c0_10 = arith.constant 0 : index
    %5 = tpu.strided_load %arg8[%c0_8, %c0_9, %c0_10] {strides = array<i32: 2, 2, 1>} : memref<18x18x3xf32, #tpu.memory_space<vmem>>, vector<8x8x3xf32>
    %6 = vector.shape_cast %5 : vector<8x8x3xf32> to vector<64x3xf32>
    %c0_11 = arith.constant 0 : index
    %c1_12 = arith.constant 1 : index
    %c0_13 = arith.constant 0 : index
    %7 = tpu.strided_load %arg8[%c0_11, %c1_12, %c0_13] {strides = array<i32: 2, 2, 1>} : memref<18x18x3xf32, #tpu.memory_space<vmem>>, vector<8x8x3xf32>
    %8 = vector.shape_cast %7 : vector<8x8x3xf32> to vector<64x3xf32>
    %c0_14 = arith.constant 0 : index
    %c2 = arith.constant 2 : index
    %c0_15 = arith.constant 0 : index
    %9 = tpu.strided_load %arg8[%c0_14, %c2, %c0_15] {strides = array<i32: 2, 2, 1>} : memref<18x18x3xf32, #tpu.memory_space<vmem>>, vector<8x8x3xf32>
    %10 = vector.shape_cast %9 : vector<8x8x3xf32> to vector<64x3xf32>
    %c1_16 = arith.constant 1 : index
    %c0_17 = arith.constant 0 : index
    %c0_18 = arith.constant 0 : index
    %11 = tpu.strided_load %arg8[%c1_16, %c0_17, %c0_18] {strides = array<i32: 2, 2, 1>} : memref<18x18x3xf32, #tpu.memory_space<vmem>>, vector<8x8x3xf32>
    %12 = vector.shape_cast %11 : vector<8x8x3xf32> to vector<64x3xf32>
    %c1_19 = arith.constant 1 : index
    %c1_20 = arith.constant 1 : index
    %c0_21 = arith.constant 0 : index
    %13 = tpu.strided_load %arg8[%c1_19, %c1_20, %c0_21] {strides = array<i32: 2, 2, 1>} : memref<18x18x3xf32, #tpu.memory_space<vmem>>, vector<8x8x3xf32>
    %14 = vector.shape_cast %13 : vector<8x8x3xf32> to vector<64x3xf32>
    %c1_22 = arith.constant 1 : index
    %c2_23 = arith.constant 2 : index
    %c0_24 = arith.constant 0 : index
    %15 = tpu.strided_load %arg8[%c1_22, %c2_23, %c0_24] {strides = array<i32: 2, 2, 1>} : memref<18x18x3xf32, #tpu.memory_space<vmem>>, vector<8x8x3xf32>
    %16 = vector.shape_cast %15 : vector<8x8x3xf32> to vector<64x3xf32>
    %c2_25 = arith.constant 2 : index
    %c0_26 = arith.constant 0 : index
    %c0_27 = arith.constant 0 : index
    %17 = tpu.strided_load %arg8[%c2_25, %c0_26, %c0_27] {strides = array<i32: 2, 2, 1>} : memref<18x18x3xf32, #tpu.memory_space<vmem>>, vector<8x8x3xf32>
    %18 = vector.shape_cast %17 : vector<8x8x3xf32> to vector<64x3xf32>
    %c2_28 = arith.constant 2 : index
    %c1_29 = arith.constant 1 : index
    %c0_30 = arith.constant 0 : index
    %19 = tpu.strided_load %arg8[%c2_28, %c1_29, %c0_30] {strides = array<i32: 2, 2, 1>} : memref<18x18x3xf32, #tpu.memory_space<vmem>>, vector<8x8x3xf32>
    %20 = vector.shape_cast %19 : vector<8x8x3xf32> to vector<64x3xf32>
    %c2_31 = arith.constant 2 : index
    %c2_32 = arith.constant 2 : index
    %c0_33 = arith.constant 0 : index
    %21 = tpu.strided_load %arg8[%c2_31, %c2_32, %c0_33] {strides = array<i32: 2, 2, 1>} : memref<18x18x3xf32, #tpu.memory_space<vmem>>, vector<8x8x3xf32>
    %22 = vector.shape_cast %21 : vector<8x8x3xf32> to vector<64x3xf32>
    %23 = tpu.concatenate %6, %8, %10, %12, %14, %16, %18, %20, %22 in 1 : vector<64x3xf32>, vector<64x3xf32>, vector<64x3xf32>, vector<64x3xf32>, vector<64x3xf32>, vector<64x3xf32>, vector<64x3xf32>, vector<64x3xf32>, vector<64x3xf32> -> vector<64x27xf32>
    %c0_34 = arith.constant 0 : index
    %c0_35 = arith.constant 0 : index
    %24 = vector.load %arg2[%c0_34, %c0_35] : memref<27x32xf32, #tpu.memory_space<vmem>>, vector<27x32xf32>
    %cst_36 = arith.constant dense<0.000000e+00> : vector<64x32xf32>
    %25 = tpu.matmul %23, %24, %cst_36 {dimension_numbers = #tpu.dot_dimension_numbers<[1], [0], [0], [1], [0, 0, 1, 1], [], []>} : vector<64x27xf32>, vector<27x32xf32>, vector<64x32xf32> -> vector<64x32xf32>
    %c0_37 = arith.constant 0 : index
    %c0_38 = arith.constant 0 : index
    %26 = vector.load %arg3[%c0_37, %c0_38] : memref<1x32xf32, #tpu.memory_space<vmem>>, vector<1x32xf32>
    %27 = vector.broadcast %26 : vector<1x32xf32> to vector<64x32xf32>
    %28 = arith.addf %25, %27 : vector<64x32xf32>
    %c0_39 = arith.constant 0 : index
    %c0_40 = arith.constant 0 : index
    %c0_41 = arith.constant 0 : index
    %29 = vector.load %arg6[%c0_39, %c0_40, %c0_41] : memref<1x64x32xf32, #tpu.memory_space<vmem>>, vector<1x64x32xf32>
    %30 = vector.shape_cast %29 : vector<1x64x32xf32> to vector<64x32xf32>
    %31 = vector.shape_cast %28 : vector<64x32xf32> to vector<1x64x32xf32>
    tpu.vector_store %arg6[%c0_39, %c0_40, %c0_41], %31 {strides = array<i32>} : memref<1x64x32xf32, #tpu.memory_space<vmem>>, vector<1x64x32xf32>,
    %cst_42 = arith.constant dense<0.000000e+00> : vector<32xf32>
    %32 = vector.multi_reduction <add>, %28, %cst_42 [0] : vector<64x32xf32> to vector<32xf32>
    %33 = vector.shape_cast %32 : vector<32xf32> to vector<1x32xf32>
    %c0_43 = arith.constant 0 : index
    %c0_44 = arith.constant 0 : index
    %c0_45 = arith.constant 0 : index
    %34 = vector.load %arg7[%c0_43, %c0_44, %c0_45] : memref<1x2x32xf32, #tpu.memory_space<vmem>>, vector<1x1x32xf32>
    %35 = vector.shape_cast %34 : vector<1x1x32xf32> to vector<1x32xf32>
    %36 = vector.shape_cast %33 : vector<1x32xf32> to vector<1x1x32xf32>
    tpu.vector_store %arg7[%c0_43, %c0_44, %c0_45], %36 {strides = array<i32>} : memref<1x2x32xf32, #tpu.memory_space<vmem>>, vector<1x1x32xf32>,
    %37 = arith.mulf %28, %28 : vector<64x32xf32>
    %cst_46 = arith.constant dense<0.000000e+00> : vector<32xf32>
    %38 = vector.multi_reduction <add>, %37, %cst_46 [0] : vector<64x32xf32> to vector<32xf32>
    %39 = vector.shape_cast %38 : vector<32xf32> to vector<1x32xf32>
    %c0_47 = arith.constant 0 : index
    %c1_48 = arith.constant 1 : index
    %c0_49 = arith.constant 0 : index
    %40 = vector.load %arg7[%c0_47, %c1_48, %c0_49] : memref<1x2x32xf32, #tpu.memory_space<vmem>>, vector<1x1x32xf32>
    %41 = vector.shape_cast %40 : vector<1x1x32xf32> to vector<1x32xf32>
    %42 = vector.shape_cast %39 : vector<1x32xf32> to vector<1x1x32xf32>
    tpu.vector_store %arg7[%c0_47, %c1_48, %c0_49], %42 {strides = array<i32>} : memref<1x2x32xf32, #tpu.memory_space<vmem>>, vector<1x1x32xf32>,
    return
  }
  func.func @transform_0(%arg0: i32) -> (i32, i32, i32, i32) {
    %c0_i32 = arith.constant 0 : i32
    %c0_i32_0 = arith.constant 0 : i32
    %c0_i32_1 = arith.constant 0 : i32
    %c0_i32_2 = arith.constant 0 : i32
    return %arg0, %c0_i32, %c0_i32_0, %c0_i32_1 : i32, i32, i32, i32
  }
  func.func @transform_1(%arg0: i32) -> (i32, i32) {
    %c0_i32 = arith.constant 0 : i32
    %c0_i32_0 = arith.constant 0 : i32
    %c0_i32_1 = arith.constant 0 : i32
    return %c0_i32, %c0_i32_0 : i32, i32
  }
  func.func @transform_2(%arg0: i32) -> (i32, i32) {
    %c0_i32 = arith.constant 0 : i32
    %c0_i32_0 = arith.constant 0 : i32
    %c0_i32_1 = arith.constant 0 : i32
    return %c0_i32, %c0_i32_0 : i32, i32
  }
  func.func @transform_3(%arg0: i32) -> (i32, i32) {
    %c0_i32 = arith.constant 0 : i32
    %c0_i32_0 = arith.constant 0 : i32
    %c0_i32_1 = arith.constant 0 : i32
    return %c0_i32, %c0_i32_0 : i32, i32
  }
  func.func @transform_4(%arg0: i32) -> (i32, i32) {
    %c0_i32 = arith.constant 0 : i32
    %c0_i32_0 = arith.constant 0 : i32
    %c0_i32_1 = arith.constant 0 : i32
    return %c0_i32, %c0_i32_0 : i32, i32
  }
  func.func @transform_5(%arg0: i32) -> (i32, i32, i32) {
    %c0_i32 = arith.constant 0 : i32
    %c0_i32_0 = arith.constant 0 : i32
    %c0_i32_1 = arith.constant 0 : i32
    return %arg0, %c0_i32, %c0_i32_0 : i32, i32, i32
  }
  func.func @transform_6(%arg0: i32) -> (i32, i32, i32) {
    %c0_i32 = arith.constant 0 : i32
    %c0_i32_0 = arith.constant 0 : i32
    %c0_i32_1 = arith.constant 0 : i32
    return %arg0, %c0_i32, %c0_i32_0 : i32, i32, i32
  }
}

module attributes {stable_mosaic.version = 11 : i64} {
  func.func @conv_stage_kernel(%arg0: i32, %arg1: memref<1x8x8x32xf32, #tpu.memory_space<vmem>>, %arg2: memref<288x64xf32, #tpu.memory_space<vmem>>, %arg3: memref<1x64xf32, #tpu.memory_space<vmem>>, %arg4: memref<1x32xf32, #tpu.memory_space<vmem>>, %arg5: memref<1x32xf32, #tpu.memory_space<vmem>>, %arg6: memref<1x16x64xf32, #tpu.memory_space<vmem>>, %arg7: memref<1x2x64xf32, #tpu.memory_space<vmem>>, %arg8: memref<10x10x32xf32, #tpu.memory_space<vmem>>) attributes {dimension_semantics = [#tpu.dimension_semantics<parallel>], iteration_bounds = array<i64: 2>, scalar_prefetch = 0 : i64, scratch_operands = 1 : i64, tpu.core_type = #tpu.core_type<tc>, window_params = [{transform_indices = @transform_0, window_bounds = array<i64: 1, 8, 8, 32>}, {pipeline_mode = #tpu.pipeline_mode<synchronous>, transform_indices = @transform_1, window_bounds = array<i64: 288, 64>}, {pipeline_mode = #tpu.pipeline_mode<synchronous>, transform_indices = @transform_2, window_bounds = array<i64: 1, 64>}, {pipeline_mode = #tpu.pipeline_mode<synchronous>, transform_indices = @transform_3, window_bounds = array<i64: 1, 32>}, {pipeline_mode = #tpu.pipeline_mode<synchronous>, transform_indices = @transform_4, window_bounds = array<i64: 1, 32>}, {transform_indices = @transform_5, window_bounds = array<i64: 1, 16, 64>}, {transform_indices = @transform_6, window_bounds = array<i64: 1, 2, 64>}]} {
    %c0 = arith.constant 0 : index
    %c0_0 = arith.constant 0 : index
    %c0_1 = arith.constant 0 : index
    %c0_2 = arith.constant 0 : index
    %0 = vector.load %arg1[%c0, %c0_0, %c0_1, %c0_2] : memref<1x8x8x32xf32, #tpu.memory_space<vmem>>, vector<1x8x8x32xf32>
    %1 = vector.shape_cast %0 : vector<1x8x8x32xf32> to vector<8x8x32xf32>
    %c0_3 = arith.constant 0 : index
    %c0_4 = arith.constant 0 : index
    %2 = vector.load %arg4[%c0_3, %c0_4] : memref<1x32xf32, #tpu.memory_space<vmem>>, vector<1x32xf32>
    %3 = vector.shape_cast %2 : vector<1x32xf32> to vector<1x1x32xf32>
    %4 = vector.broadcast %3 : vector<1x1x32xf32> to vector<8x8x32xf32>
    %5 = arith.mulf %1, %4 : vector<8x8x32xf32>
    %c0_5 = arith.constant 0 : index
    %c0_6 = arith.constant 0 : index
    %6 = vector.load %arg5[%c0_5, %c0_6] : memref<1x32xf32, #tpu.memory_space<vmem>>, vector<1x32xf32>
    %7 = vector.shape_cast %6 : vector<1x32xf32> to vector<1x1x32xf32>
    %8 = vector.broadcast %7 : vector<1x1x32xf32> to vector<8x8x32xf32>
    %9 = arith.addf %5, %8 : vector<8x8x32xf32>
    %cst = arith.constant 0.000000e+00 : f32
    %10 = vector.broadcast %cst : f32 to vector<8x8x32xf32>
    %11 = arith.subf %10, %9 : vector<8x8x32xf32>
    %12 = math.exp %11 : vector<8x8x32xf32>
    %cst_7 = arith.constant 1.000000e+00 : f32
    %13 = vector.broadcast %cst_7 : f32 to vector<8x8x32xf32>
    %14 = arith.addf %13, %12 : vector<8x8x32xf32>
    %cst_8 = arith.constant 1.000000e+00 : f32
    %15 = vector.broadcast %cst_8 : f32 to vector<8x8x32xf32>
    %16 = arith.divf %15, %14 : vector<8x8x32xf32>
    %17 = arith.mulf %9, %16 : vector<8x8x32xf32>
    %cst_9 = arith.constant 0.000000e+00 : f32
    %18 = vector.broadcast %cst_9 : f32 to vector<10x10x32xf32>
    %c0_10 = arith.constant 0 : index
    %c0_11 = arith.constant 0 : index
    %c0_12 = arith.constant 0 : index
    %19 = vector.load %arg8[%c0_10, %c0_11, %c0_12] : memref<10x10x32xf32, #tpu.memory_space<vmem>>, vector<10x10x32xf32>
    tpu.vector_store %arg8[%c0_10, %c0_11, %c0_12], %18 {strides = array<i32>} : memref<10x10x32xf32, #tpu.memory_space<vmem>>, vector<10x10x32xf32>,
    %c1 = arith.constant 1 : index
    %c1_13 = arith.constant 1 : index
    %c0_14 = arith.constant 0 : index
    %20 = vector.load %arg8[%c1, %c1_13, %c0_14] : memref<10x10x32xf32, #tpu.memory_space<vmem>>, vector<8x8x32xf32>
    tpu.vector_store %arg8[%c1, %c1_13, %c0_14], %17 {strides = array<i32>} : memref<10x10x32xf32, #tpu.memory_space<vmem>>, vector<8x8x32xf32>,
    %c0_15 = arith.constant 0 : index
    %c0_16 = arith.constant 0 : index
    %c0_17 = arith.constant 0 : index
    %21 = tpu.strided_load %arg8[%c0_15, %c0_16, %c0_17] {strides = array<i32: 2, 2, 1>} : memref<10x10x32xf32, #tpu.memory_space<vmem>>, vector<4x4x32xf32>
    %22 = vector.shape_cast %21 : vector<4x4x32xf32> to vector<16x32xf32>
    %c0_18 = arith.constant 0 : index
    %c1_19 = arith.constant 1 : index
    %c0_20 = arith.constant 0 : index
    %23 = tpu.strided_load %arg8[%c0_18, %c1_19, %c0_20] {strides = array<i32: 2, 2, 1>} : memref<10x10x32xf32, #tpu.memory_space<vmem>>, vector<4x4x32xf32>
    %24 = vector.shape_cast %23 : vector<4x4x32xf32> to vector<16x32xf32>
    %c0_21 = arith.constant 0 : index
    %c2 = arith.constant 2 : index
    %c0_22 = arith.constant 0 : index
    %25 = tpu.strided_load %arg8[%c0_21, %c2, %c0_22] {strides = array<i32: 2, 2, 1>} : memref<10x10x32xf32, #tpu.memory_space<vmem>>, vector<4x4x32xf32>
    %26 = vector.shape_cast %25 : vector<4x4x32xf32> to vector<16x32xf32>
    %c1_23 = arith.constant 1 : index
    %c0_24 = arith.constant 0 : index
    %c0_25 = arith.constant 0 : index
    %27 = tpu.strided_load %arg8[%c1_23, %c0_24, %c0_25] {strides = array<i32: 2, 2, 1>} : memref<10x10x32xf32, #tpu.memory_space<vmem>>, vector<4x4x32xf32>
    %28 = vector.shape_cast %27 : vector<4x4x32xf32> to vector<16x32xf32>
    %c1_26 = arith.constant 1 : index
    %c1_27 = arith.constant 1 : index
    %c0_28 = arith.constant 0 : index
    %29 = tpu.strided_load %arg8[%c1_26, %c1_27, %c0_28] {strides = array<i32: 2, 2, 1>} : memref<10x10x32xf32, #tpu.memory_space<vmem>>, vector<4x4x32xf32>
    %30 = vector.shape_cast %29 : vector<4x4x32xf32> to vector<16x32xf32>
    %c1_29 = arith.constant 1 : index
    %c2_30 = arith.constant 2 : index
    %c0_31 = arith.constant 0 : index
    %31 = tpu.strided_load %arg8[%c1_29, %c2_30, %c0_31] {strides = array<i32: 2, 2, 1>} : memref<10x10x32xf32, #tpu.memory_space<vmem>>, vector<4x4x32xf32>
    %32 = vector.shape_cast %31 : vector<4x4x32xf32> to vector<16x32xf32>
    %c2_32 = arith.constant 2 : index
    %c0_33 = arith.constant 0 : index
    %c0_34 = arith.constant 0 : index
    %33 = tpu.strided_load %arg8[%c2_32, %c0_33, %c0_34] {strides = array<i32: 2, 2, 1>} : memref<10x10x32xf32, #tpu.memory_space<vmem>>, vector<4x4x32xf32>
    %34 = vector.shape_cast %33 : vector<4x4x32xf32> to vector<16x32xf32>
    %c2_35 = arith.constant 2 : index
    %c1_36 = arith.constant 1 : index
    %c0_37 = arith.constant 0 : index
    %35 = tpu.strided_load %arg8[%c2_35, %c1_36, %c0_37] {strides = array<i32: 2, 2, 1>} : memref<10x10x32xf32, #tpu.memory_space<vmem>>, vector<4x4x32xf32>
    %36 = vector.shape_cast %35 : vector<4x4x32xf32> to vector<16x32xf32>
    %c2_38 = arith.constant 2 : index
    %c2_39 = arith.constant 2 : index
    %c0_40 = arith.constant 0 : index
    %37 = tpu.strided_load %arg8[%c2_38, %c2_39, %c0_40] {strides = array<i32: 2, 2, 1>} : memref<10x10x32xf32, #tpu.memory_space<vmem>>, vector<4x4x32xf32>
    %38 = vector.shape_cast %37 : vector<4x4x32xf32> to vector<16x32xf32>
    %39 = tpu.concatenate %22, %24, %26, %28, %30, %32, %34, %36, %38 in 1 : vector<16x32xf32>, vector<16x32xf32>, vector<16x32xf32>, vector<16x32xf32>, vector<16x32xf32>, vector<16x32xf32>, vector<16x32xf32>, vector<16x32xf32>, vector<16x32xf32> -> vector<16x288xf32>
    %c0_41 = arith.constant 0 : index
    %c0_42 = arith.constant 0 : index
    %40 = vector.load %arg2[%c0_41, %c0_42] : memref<288x64xf32, #tpu.memory_space<vmem>>, vector<288x64xf32>
    %cst_43 = arith.constant dense<0.000000e+00> : vector<16x64xf32>
    %41 = tpu.matmul %39, %40, %cst_43 {dimension_numbers = #tpu.dot_dimension_numbers<[1], [0], [0], [1], [0, 0, 1, 1], [], []>} : vector<16x288xf32>, vector<288x64xf32>, vector<16x64xf32> -> vector<16x64xf32>
    %c0_44 = arith.constant 0 : index
    %c0_45 = arith.constant 0 : index
    %42 = vector.load %arg3[%c0_44, %c0_45] : memref<1x64xf32, #tpu.memory_space<vmem>>, vector<1x64xf32>
    %43 = vector.broadcast %42 : vector<1x64xf32> to vector<16x64xf32>
    %44 = arith.addf %41, %43 : vector<16x64xf32>
    %c0_46 = arith.constant 0 : index
    %c0_47 = arith.constant 0 : index
    %c0_48 = arith.constant 0 : index
    %45 = vector.load %arg6[%c0_46, %c0_47, %c0_48] : memref<1x16x64xf32, #tpu.memory_space<vmem>>, vector<1x16x64xf32>
    %46 = vector.shape_cast %45 : vector<1x16x64xf32> to vector<16x64xf32>
    %47 = vector.shape_cast %44 : vector<16x64xf32> to vector<1x16x64xf32>
    tpu.vector_store %arg6[%c0_46, %c0_47, %c0_48], %47 {strides = array<i32>} : memref<1x16x64xf32, #tpu.memory_space<vmem>>, vector<1x16x64xf32>,
    %cst_49 = arith.constant dense<0.000000e+00> : vector<64xf32>
    %48 = vector.multi_reduction <add>, %44, %cst_49 [0] : vector<16x64xf32> to vector<64xf32>
    %49 = vector.shape_cast %48 : vector<64xf32> to vector<1x64xf32>
    %c0_50 = arith.constant 0 : index
    %c0_51 = arith.constant 0 : index
    %c0_52 = arith.constant 0 : index
    %50 = vector.load %arg7[%c0_50, %c0_51, %c0_52] : memref<1x2x64xf32, #tpu.memory_space<vmem>>, vector<1x1x64xf32>
    %51 = vector.shape_cast %50 : vector<1x1x64xf32> to vector<1x64xf32>
    %52 = vector.shape_cast %49 : vector<1x64xf32> to vector<1x1x64xf32>
    tpu.vector_store %arg7[%c0_50, %c0_51, %c0_52], %52 {strides = array<i32>} : memref<1x2x64xf32, #tpu.memory_space<vmem>>, vector<1x1x64xf32>,
    %53 = arith.mulf %44, %44 : vector<16x64xf32>
    %cst_53 = arith.constant dense<0.000000e+00> : vector<64xf32>
    %54 = vector.multi_reduction <add>, %53, %cst_53 [0] : vector<16x64xf32> to vector<64xf32>
    %55 = vector.shape_cast %54 : vector<64xf32> to vector<1x64xf32>
    %c0_54 = arith.constant 0 : index
    %c1_55 = arith.constant 1 : index
    %c0_56 = arith.constant 0 : index
    %56 = vector.load %arg7[%c0_54, %c1_55, %c0_56] : memref<1x2x64xf32, #tpu.memory_space<vmem>>, vector<1x1x64xf32>
    %57 = vector.shape_cast %56 : vector<1x1x64xf32> to vector<1x64xf32>
    %58 = vector.shape_cast %55 : vector<1x64xf32> to vector<1x1x64xf32>
    tpu.vector_store %arg7[%c0_54, %c1_55, %c0_56], %58 {strides = array<i32>} : memref<1x2x64xf32, #tpu.memory_space<vmem>>, vector<1x1x64xf32>,
    return
  }
  func.func @transform_0(%arg0: i32) -> (i32, i32, i32, i32) {
    %c0_i32 = arith.constant 0 : i32
    %c0_i32_0 = arith.constant 0 : i32
    %c0_i32_1 = arith.constant 0 : i32
    %c0_i32_2 = arith.constant 0 : i32
    return %arg0, %c0_i32, %c0_i32_0, %c0_i32_1 : i32, i32, i32, i32
  }
  func.func @transform_1(%arg0: i32) -> (i32, i32) {
    %c0_i32 = arith.constant 0 : i32
    %c0_i32_0 = arith.constant 0 : i32
    %c0_i32_1 = arith.constant 0 : i32
    return %c0_i32, %c0_i32_0 : i32, i32
  }
  func.func @transform_2(%arg0: i32) -> (i32, i32) {
    %c0_i32 = arith.constant 0 : i32
    %c0_i32_0 = arith.constant 0 : i32
    %c0_i32_1 = arith.constant 0 : i32
    return %c0_i32, %c0_i32_0 : i32, i32
  }
  func.func @transform_3(%arg0: i32) -> (i32, i32) {
    %c0_i32 = arith.constant 0 : i32
    %c0_i32_0 = arith.constant 0 : i32
    %c0_i32_1 = arith.constant 0 : i32
    return %c0_i32, %c0_i32_0 : i32, i32
  }
  func.func @transform_4(%arg0: i32) -> (i32, i32) {
    %c0_i32 = arith.constant 0 : i32
    %c0_i32_0 = arith.constant 0 : i32
    %c0_i32_1 = arith.constant 0 : i32
    return %c0_i32, %c0_i32_0 : i32, i32
  }
  func.func @transform_5(%arg0: i32) -> (i32, i32, i32) {
    %c0_i32 = arith.constant 0 : i32
    %c0_i32_0 = arith.constant 0 : i32
    %c0_i32_1 = arith.constant 0 : i32
    return %arg0, %c0_i32, %c0_i32_0 : i32, i32, i32
  }
  func.func @transform_6(%arg0: i32) -> (i32, i32, i32) {
    %c0_i32 = arith.constant 0 : i32
    %c0_i32_0 = arith.constant 0 : i32
    %c0_i32_1 = arith.constant 0 : i32
    return %arg0, %c0_i32, %c0_i32_0 : i32, i32, i32
  }
}

module attributes {stable_mosaic.version = 11 : i64} {
  func.func @conv_stage_kernel(%arg0: i32, %arg1: memref<1x4x4x64xf32, #tpu.memory_space<vmem>>, %arg2: memref<576x128xf32, #tpu.memory_space<vmem>>, %arg3: memref<1x128xf32, #tpu.memory_space<vmem>>, %arg4: memref<1x64xf32, #tpu.memory_space<vmem>>, %arg5: memref<1x64xf32, #tpu.memory_space<vmem>>, %arg6: memref<1x4x128xf32, #tpu.memory_space<vmem>>, %arg7: memref<1x2x128xf32, #tpu.memory_space<vmem>>, %arg8: memref<6x6x64xf32, #tpu.memory_space<vmem>>) attributes {dimension_semantics = [#tpu.dimension_semantics<parallel>], iteration_bounds = array<i64: 2>, scalar_prefetch = 0 : i64, scratch_operands = 1 : i64, tpu.core_type = #tpu.core_type<tc>, window_params = [{transform_indices = @transform_0, window_bounds = array<i64: 1, 4, 4, 64>}, {pipeline_mode = #tpu.pipeline_mode<synchronous>, transform_indices = @transform_1, window_bounds = array<i64: 576, 128>}, {pipeline_mode = #tpu.pipeline_mode<synchronous>, transform_indices = @transform_2, window_bounds = array<i64: 1, 128>}, {pipeline_mode = #tpu.pipeline_mode<synchronous>, transform_indices = @transform_3, window_bounds = array<i64: 1, 64>}, {pipeline_mode = #tpu.pipeline_mode<synchronous>, transform_indices = @transform_4, window_bounds = array<i64: 1, 64>}, {transform_indices = @transform_5, window_bounds = array<i64: 1, 4, 128>}, {transform_indices = @transform_6, window_bounds = array<i64: 1, 2, 128>}]} {
    %c0 = arith.constant 0 : index
    %c0_0 = arith.constant 0 : index
    %c0_1 = arith.constant 0 : index
    %c0_2 = arith.constant 0 : index
    %0 = vector.load %arg1[%c0, %c0_0, %c0_1, %c0_2] : memref<1x4x4x64xf32, #tpu.memory_space<vmem>>, vector<1x4x4x64xf32>
    %1 = vector.shape_cast %0 : vector<1x4x4x64xf32> to vector<4x4x64xf32>
    %c0_3 = arith.constant 0 : index
    %c0_4 = arith.constant 0 : index
    %2 = vector.load %arg4[%c0_3, %c0_4] : memref<1x64xf32, #tpu.memory_space<vmem>>, vector<1x64xf32>
    %3 = vector.shape_cast %2 : vector<1x64xf32> to vector<1x1x64xf32>
    %4 = vector.broadcast %3 : vector<1x1x64xf32> to vector<4x4x64xf32>
    %5 = arith.mulf %1, %4 : vector<4x4x64xf32>
    %c0_5 = arith.constant 0 : index
    %c0_6 = arith.constant 0 : index
    %6 = vector.load %arg5[%c0_5, %c0_6] : memref<1x64xf32, #tpu.memory_space<vmem>>, vector<1x64xf32>
    %7 = vector.shape_cast %6 : vector<1x64xf32> to vector<1x1x64xf32>
    %8 = vector.broadcast %7 : vector<1x1x64xf32> to vector<4x4x64xf32>
    %9 = arith.addf %5, %8 : vector<4x4x64xf32>
    %cst = arith.constant 0.000000e+00 : f32
    %10 = vector.broadcast %cst : f32 to vector<4x4x64xf32>
    %11 = arith.subf %10, %9 : vector<4x4x64xf32>
    %12 = math.exp %11 : vector<4x4x64xf32>
    %cst_7 = arith.constant 1.000000e+00 : f32
    %13 = vector.broadcast %cst_7 : f32 to vector<4x4x64xf32>
    %14 = arith.addf %13, %12 : vector<4x4x64xf32>
    %cst_8 = arith.constant 1.000000e+00 : f32
    %15 = vector.broadcast %cst_8 : f32 to vector<4x4x64xf32>
    %16 = arith.divf %15, %14 : vector<4x4x64xf32>
    %17 = arith.mulf %9, %16 : vector<4x4x64xf32>
    %cst_9 = arith.constant 0.000000e+00 : f32
    %18 = vector.broadcast %cst_9 : f32 to vector<6x6x64xf32>
    %c0_10 = arith.constant 0 : index
    %c0_11 = arith.constant 0 : index
    %c0_12 = arith.constant 0 : index
    %19 = vector.load %arg8[%c0_10, %c0_11, %c0_12] : memref<6x6x64xf32, #tpu.memory_space<vmem>>, vector<6x6x64xf32>
    tpu.vector_store %arg8[%c0_10, %c0_11, %c0_12], %18 {strides = array<i32>} : memref<6x6x64xf32, #tpu.memory_space<vmem>>, vector<6x6x64xf32>,
    %c1 = arith.constant 1 : index
    %c1_13 = arith.constant 1 : index
    %c0_14 = arith.constant 0 : index
    %20 = vector.load %arg8[%c1, %c1_13, %c0_14] : memref<6x6x64xf32, #tpu.memory_space<vmem>>, vector<4x4x64xf32>
    tpu.vector_store %arg8[%c1, %c1_13, %c0_14], %17 {strides = array<i32>} : memref<6x6x64xf32, #tpu.memory_space<vmem>>, vector<4x4x64xf32>,
    %c0_15 = arith.constant 0 : index
    %c0_16 = arith.constant 0 : index
    %c0_17 = arith.constant 0 : index
    %21 = tpu.strided_load %arg8[%c0_15, %c0_16, %c0_17] {strides = array<i32: 2, 2, 1>} : memref<6x6x64xf32, #tpu.memory_space<vmem>>, vector<2x2x64xf32>
    %22 = vector.shape_cast %21 : vector<2x2x64xf32> to vector<4x64xf32>
    %c0_18 = arith.constant 0 : index
    %c1_19 = arith.constant 1 : index
    %c0_20 = arith.constant 0 : index
    %23 = tpu.strided_load %arg8[%c0_18, %c1_19, %c0_20] {strides = array<i32: 2, 2, 1>} : memref<6x6x64xf32, #tpu.memory_space<vmem>>, vector<2x2x64xf32>
    %24 = vector.shape_cast %23 : vector<2x2x64xf32> to vector<4x64xf32>
    %c0_21 = arith.constant 0 : index
    %c2 = arith.constant 2 : index
    %c0_22 = arith.constant 0 : index
    %25 = tpu.strided_load %arg8[%c0_21, %c2, %c0_22] {strides = array<i32: 2, 2, 1>} : memref<6x6x64xf32, #tpu.memory_space<vmem>>, vector<2x2x64xf32>
    %26 = vector.shape_cast %25 : vector<2x2x64xf32> to vector<4x64xf32>
    %c1_23 = arith.constant 1 : index
    %c0_24 = arith.constant 0 : index
    %c0_25 = arith.constant 0 : index
    %27 = tpu.strided_load %arg8[%c1_23, %c0_24, %c0_25] {strides = array<i32: 2, 2, 1>} : memref<6x6x64xf32, #tpu.memory_space<vmem>>, vector<2x2x64xf32>
    %28 = vector.shape_cast %27 : vector<2x2x64xf32> to vector<4x64xf32>
    %c1_26 = arith.constant 1 : index
    %c1_27 = arith.constant 1 : index
    %c0_28 = arith.constant 0 : index
    %29 = tpu.strided_load %arg8[%c1_26, %c1_27, %c0_28] {strides = array<i32: 2, 2, 1>} : memref<6x6x64xf32, #tpu.memory_space<vmem>>, vector<2x2x64xf32>
    %30 = vector.shape_cast %29 : vector<2x2x64xf32> to vector<4x64xf32>
    %c1_29 = arith.constant 1 : index
    %c2_30 = arith.constant 2 : index
    %c0_31 = arith.constant 0 : index
    %31 = tpu.strided_load %arg8[%c1_29, %c2_30, %c0_31] {strides = array<i32: 2, 2, 1>} : memref<6x6x64xf32, #tpu.memory_space<vmem>>, vector<2x2x64xf32>
    %32 = vector.shape_cast %31 : vector<2x2x64xf32> to vector<4x64xf32>
    %c2_32 = arith.constant 2 : index
    %c0_33 = arith.constant 0 : index
    %c0_34 = arith.constant 0 : index
    %33 = tpu.strided_load %arg8[%c2_32, %c0_33, %c0_34] {strides = array<i32: 2, 2, 1>} : memref<6x6x64xf32, #tpu.memory_space<vmem>>, vector<2x2x64xf32>
    %34 = vector.shape_cast %33 : vector<2x2x64xf32> to vector<4x64xf32>
    %c2_35 = arith.constant 2 : index
    %c1_36 = arith.constant 1 : index
    %c0_37 = arith.constant 0 : index
    %35 = tpu.strided_load %arg8[%c2_35, %c1_36, %c0_37] {strides = array<i32: 2, 2, 1>} : memref<6x6x64xf32, #tpu.memory_space<vmem>>, vector<2x2x64xf32>
    %36 = vector.shape_cast %35 : vector<2x2x64xf32> to vector<4x64xf32>
    %c2_38 = arith.constant 2 : index
    %c2_39 = arith.constant 2 : index
    %c0_40 = arith.constant 0 : index
    %37 = tpu.strided_load %arg8[%c2_38, %c2_39, %c0_40] {strides = array<i32: 2, 2, 1>} : memref<6x6x64xf32, #tpu.memory_space<vmem>>, vector<2x2x64xf32>
    %38 = vector.shape_cast %37 : vector<2x2x64xf32> to vector<4x64xf32>
    %39 = tpu.concatenate %22, %24, %26, %28, %30, %32, %34, %36, %38 in 1 : vector<4x64xf32>, vector<4x64xf32>, vector<4x64xf32>, vector<4x64xf32>, vector<4x64xf32>, vector<4x64xf32>, vector<4x64xf32>, vector<4x64xf32>, vector<4x64xf32> -> vector<4x576xf32>
    %c0_41 = arith.constant 0 : index
    %c0_42 = arith.constant 0 : index
    %40 = vector.load %arg2[%c0_41, %c0_42] : memref<576x128xf32, #tpu.memory_space<vmem>>, vector<576x128xf32>
    %cst_43 = arith.constant dense<0.000000e+00> : vector<4x128xf32>
    %41 = tpu.matmul %39, %40, %cst_43 {dimension_numbers = #tpu.dot_dimension_numbers<[1], [0], [0], [1], [0, 0, 1, 1], [], []>} : vector<4x576xf32>, vector<576x128xf32>, vector<4x128xf32> -> vector<4x128xf32>
    %c0_44 = arith.constant 0 : index
    %c0_45 = arith.constant 0 : index
    %42 = vector.load %arg3[%c0_44, %c0_45] : memref<1x128xf32, #tpu.memory_space<vmem>>, vector<1x128xf32>
    %43 = vector.broadcast %42 : vector<1x128xf32> to vector<4x128xf32>
    %44 = arith.addf %41, %43 : vector<4x128xf32>
    %c0_46 = arith.constant 0 : index
    %c0_47 = arith.constant 0 : index
    %c0_48 = arith.constant 0 : index
    %45 = vector.load %arg6[%c0_46, %c0_47, %c0_48] : memref<1x4x128xf32, #tpu.memory_space<vmem>>, vector<1x4x128xf32>
    %46 = vector.shape_cast %45 : vector<1x4x128xf32> to vector<4x128xf32>
    %47 = vector.shape_cast %44 : vector<4x128xf32> to vector<1x4x128xf32>
    tpu.vector_store %arg6[%c0_46, %c0_47, %c0_48], %47 {strides = array<i32>} : memref<1x4x128xf32, #tpu.memory_space<vmem>>, vector<1x4x128xf32>,
    %cst_49 = arith.constant dense<0.000000e+00> : vector<128xf32>
    %48 = vector.multi_reduction <add>, %44, %cst_49 [0] : vector<4x128xf32> to vector<128xf32>
    %49 = vector.shape_cast %48 : vector<128xf32> to vector<1x128xf32>
    %c0_50 = arith.constant 0 : index
    %c0_51 = arith.constant 0 : index
    %c0_52 = arith.constant 0 : index
    %50 = vector.load %arg7[%c0_50, %c0_51, %c0_52] : memref<1x2x128xf32, #tpu.memory_space<vmem>>, vector<1x1x128xf32>
    %51 = vector.shape_cast %50 : vector<1x1x128xf32> to vector<1x128xf32>
    %52 = vector.shape_cast %49 : vector<1x128xf32> to vector<1x1x128xf32>
    tpu.vector_store %arg7[%c0_50, %c0_51, %c0_52], %52 {strides = array<i32>} : memref<1x2x128xf32, #tpu.memory_space<vmem>>, vector<1x1x128xf32>,
    %53 = arith.mulf %44, %44 : vector<4x128xf32>
    %cst_53 = arith.constant dense<0.000000e+00> : vector<128xf32>
    %54 = vector.multi_reduction <add>, %53, %cst_53 [0] : vector<4x128xf32> to vector<128xf32>
    %55 = vector.shape_cast %54 : vector<128xf32> to vector<1x128xf32>
    %c0_54 = arith.constant 0 : index
    %c1_55 = arith.constant 1 : index
    %c0_56 = arith.constant 0 : index
    %56 = vector.load %arg7[%c0_54, %c1_55, %c0_56] : memref<1x2x128xf32, #tpu.memory_space<vmem>>, vector<1x1x128xf32>
    %57 = vector.shape_cast %56 : vector<1x1x128xf32> to vector<1x128xf32>
    %58 = vector.shape_cast %55 : vector<1x128xf32> to vector<1x1x128xf32>
    tpu.vector_store %arg7[%c0_54, %c1_55, %c0_56], %58 {strides = array<i32>} : memref<1x2x128xf32, #tpu.memory_space<vmem>>, vector<1x1x128xf32>,
    return
  }
  func.func @transform_0(%arg0: i32) -> (i32, i32, i32, i32) {
    %c0_i32 = arith.constant 0 : i32
    %c0_i32_0 = arith.constant 0 : i32
    %c0_i32_1 = arith.constant 0 : i32
    %c0_i32_2 = arith.constant 0 : i32
    return %arg0, %c0_i32, %c0_i32_0, %c0_i32_1 : i32, i32, i32, i32
  }
  func.func @transform_1(%arg0: i32) -> (i32, i32) {
    %c0_i32 = arith.constant 0 : i32
    %c0_i32_0 = arith.constant 0 : i32
    %c0_i32_1 = arith.constant 0 : i32
    return %c0_i32, %c0_i32_0 : i32, i32
  }
  func.func @transform_2(%arg0: i32) -> (i32, i32) {
    %c0_i32 = arith.constant 0 : i32
    %c0_i32_0 = arith.constant 0 : i32
    %c0_i32_1 = arith.constant 0 : i32
    return %c0_i32, %c0_i32_0 : i32, i32
  }
  func.func @transform_3(%arg0: i32) -> (i32, i32) {
    %c0_i32 = arith.constant 0 : i32
    %c0_i32_0 = arith.constant 0 : i32
    %c0_i32_1 = arith.constant 0 : i32
    return %c0_i32, %c0_i32_0 : i32, i32
  }
  func.func @transform_4(%arg0: i32) -> (i32, i32) {
    %c0_i32 = arith.constant 0 : i32
    %c0_i32_0 = arith.constant 0 : i32
    %c0_i32_1 = arith.constant 0 : i32
    return %c0_i32, %c0_i32_0 : i32, i32
  }
  func.func @transform_5(%arg0: i32) -> (i32, i32, i32) {
    %c0_i32 = arith.constant 0 : i32
    %c0_i32_0 = arith.constant 0 : i32
    %c0_i32_1 = arith.constant 0 : i32
    return %arg0, %c0_i32, %c0_i32_0 : i32, i32, i32
  }
  func.func @transform_6(%arg0: i32) -> (i32, i32, i32) {
    %c0_i32 = arith.constant 0 : i32
    %c0_i32_0 = arith.constant 0 : i32
    %c0_i32_1 = arith.constant 0 : i32
    return %arg0, %c0_i32, %c0_i32_0 : i32, i32, i32
  }
}

module attributes {stable_mosaic.version = 11 : i64} {
  func.func @head_kernel(%arg0: i32, %arg1: memref<1x4x128xf32, #tpu.memory_space<vmem>>, %arg2: memref<1x128xf32, #tpu.memory_space<vmem>>, %arg3: memref<1x128xf32, #tpu.memory_space<vmem>>, %arg4: memref<1x128xf32, #tpu.memory_space<vmem>>, %arg5: memref<1x1xf32, #tpu.memory_space<vmem>>, %arg6: memref<1x1x1xf32, #tpu.memory_space<vmem>>) attributes {dimension_semantics = [#tpu.dimension_semantics<parallel>], iteration_bounds = array<i64: 2>, scalar_prefetch = 0 : i64, scratch_operands = 0 : i64, tpu.core_type = #tpu.core_type<tc>, window_params = [{transform_indices = @transform_0, window_bounds = array<i64: 1, 4, 128>}, {pipeline_mode = #tpu.pipeline_mode<synchronous>, transform_indices = @transform_1, window_bounds = array<i64: 1, 128>}, {pipeline_mode = #tpu.pipeline_mode<synchronous>, transform_indices = @transform_2, window_bounds = array<i64: 1, 128>}, {pipeline_mode = #tpu.pipeline_mode<synchronous>, transform_indices = @transform_3, window_bounds = array<i64: 1, 128>}, {pipeline_mode = #tpu.pipeline_mode<synchronous>, transform_indices = @transform_4, window_bounds = array<i64: 1, 1>}, {transform_indices = @transform_5, window_bounds = array<i64: 1, 1, 1>}]} {
    %c0 = arith.constant 0 : index
    %c0_0 = arith.constant 0 : index
    %c0_1 = arith.constant 0 : index
    %0 = vector.load %arg1[%c0, %c0_0, %c0_1] : memref<1x4x128xf32, #tpu.memory_space<vmem>>, vector<1x4x128xf32>
    %1 = vector.shape_cast %0 : vector<1x4x128xf32> to vector<4x128xf32>
    %c0_2 = arith.constant 0 : index
    %c0_3 = arith.constant 0 : index
    %2 = vector.load %arg2[%c0_2, %c0_3] : memref<1x128xf32, #tpu.memory_space<vmem>>, vector<1x128xf32>
    %3 = vector.broadcast %2 : vector<1x128xf32> to vector<4x128xf32>
    %4 = arith.mulf %1, %3 : vector<4x128xf32>
    %c0_4 = arith.constant 0 : index
    %c0_5 = arith.constant 0 : index
    %5 = vector.load %arg3[%c0_4, %c0_5] : memref<1x128xf32, #tpu.memory_space<vmem>>, vector<1x128xf32>
    %6 = vector.broadcast %5 : vector<1x128xf32> to vector<4x128xf32>
    %7 = arith.addf %4, %6 : vector<4x128xf32>
    %cst = arith.constant 0.000000e+00 : f32
    %8 = vector.broadcast %cst : f32 to vector<4x128xf32>
    %9 = arith.subf %8, %7 : vector<4x128xf32>
    %10 = math.exp %9 : vector<4x128xf32>
    %cst_6 = arith.constant 1.000000e+00 : f32
    %11 = vector.broadcast %cst_6 : f32 to vector<4x128xf32>
    %12 = arith.addf %11, %10 : vector<4x128xf32>
    %cst_7 = arith.constant 1.000000e+00 : f32
    %13 = vector.broadcast %cst_7 : f32 to vector<4x128xf32>
    %14 = arith.divf %13, %12 : vector<4x128xf32>
    %15 = arith.mulf %7, %14 : vector<4x128xf32>
    %cst_8 = arith.constant dense<0.000000e+00> : vector<128xf32>
    %16 = vector.multi_reduction <add>, %15, %cst_8 [0] : vector<4x128xf32> to vector<128xf32>
    %17 = vector.shape_cast %16 : vector<128xf32> to vector<1x128xf32>
    %c0_9 = arith.constant 0 : index
    %c0_10 = arith.constant 0 : index
    %18 = vector.load %arg4[%c0_9, %c0_10] : memref<1x128xf32, #tpu.memory_space<vmem>>, vector<1x128xf32>
    %19 = arith.mulf %17, %18 : vector<1x128xf32>
    %cst_11 = arith.constant dense<0.000000e+00> : vector<1xf32>
    %20 = vector.multi_reduction <add>, %19, %cst_11 [1] : vector<1x128xf32> to vector<1xf32>
    %21 = vector.shape_cast %20 : vector<1xf32> to vector<1x1xf32>
    %cst_12 = arith.constant 1.600000e+01 : f32
    %22 = vector.broadcast %cst_12 : f32 to vector<1x1xf32>
    %23 = arith.divf %21, %22 : vector<1x1xf32>
    %c0_13 = arith.constant 0 : index
    %c0_14 = arith.constant 0 : index
    %24 = vector.load %arg5[%c0_13, %c0_14] : memref<1x1xf32, #tpu.memory_space<vmem>>, vector<1x1xf32>
    %25 = arith.addf %23, %24 : vector<1x1xf32>
    %cst_15 = arith.constant 0.000000e+00 : f32
    %26 = vector.broadcast %cst_15 : f32 to vector<1x1xf32>
    %27 = arith.subf %26, %25 : vector<1x1xf32>
    %28 = math.exp %27 : vector<1x1xf32>
    %cst_16 = arith.constant 1.000000e+00 : f32
    %29 = vector.broadcast %cst_16 : f32 to vector<1x1xf32>
    %30 = arith.addf %29, %28 : vector<1x1xf32>
    %cst_17 = arith.constant 1.000000e+00 : f32
    %31 = vector.broadcast %cst_17 : f32 to vector<1x1xf32>
    %32 = arith.divf %31, %30 : vector<1x1xf32>
    %c0_18 = arith.constant 0 : index
    %c0_19 = arith.constant 0 : index
    %c0_20 = arith.constant 0 : index
    %33 = vector.load %arg6[%c0_18, %c0_19, %c0_20] : memref<1x1x1xf32, #tpu.memory_space<vmem>>, vector<1x1x1xf32>
    %34 = vector.shape_cast %33 : vector<1x1x1xf32> to vector<1x1xf32>
    %35 = vector.shape_cast %32 : vector<1x1xf32> to vector<1x1x1xf32>
    tpu.vector_store %arg6[%c0_18, %c0_19, %c0_20], %35 {strides = array<i32>} : memref<1x1x1xf32, #tpu.memory_space<vmem>>, vector<1x1x1xf32>,
    return
  }
  func.func @transform_0(%arg0: i32) -> (i32, i32, i32) {
    %c0_i32 = arith.constant 0 : i32
    %c0_i32_0 = arith.constant 0 : i32
    %c0_i32_1 = arith.constant 0 : i32
    return %arg0, %c0_i32, %c0_i32_0 : i32, i32, i32
  }
  func.func @transform_1(%arg0: i32) -> (i32, i32) {
    %c0_i32 = arith.constant 0 : i32
    %c0_i32_0 = arith.constant 0 : i32
    %c0_i32_1 = arith.constant 0 : i32
    return %c0_i32, %c0_i32_0 : i32, i32
  }
  func.func @transform_2(%arg0: i32) -> (i32, i32) {
    %c0_i32 = arith.constant 0 : i32
    %c0_i32_0 = arith.constant 0 : i32
    %c0_i32_1 = arith.constant 0 : i32
    return %c0_i32, %c0_i32_0 : i32, i32
  }
  func.func @transform_3(%arg0: i32) -> (i32, i32) {
    %c0_i32 = arith.constant 0 : i32
    %c0_i32_0 = arith.constant 0 : i32
    %c0_i32_1 = arith.constant 0 : i32
    return %c0_i32, %c0_i32_0 : i32, i32
  }
  func.func @transform_4(%arg0: i32) -> (i32, i32) {
    %c0_i32 = arith.constant 0 : i32
    %c0_i32_0 = arith.constant 0 : i32
    %c0_i32_1 = arith.constant 0 : i32
    return %c0_i32, %c0_i32_0 : i32, i32
  }
  func.func @transform_5(%arg0: i32) -> (i32, i32, i32) {
    %c0_i32 = arith.constant 0 : i32
    %c0_i32_0 = arith.constant 0 : i32
    %c0_i32_1 = arith.constant 0 : i32
    return %arg0, %c0_i32, %c0_i32_0 : i32, i32, i32
  }
}

</mosaic_0001>

<bundles_post_ra>
// kernel: discriminator_forward.7
= control target key start
LH: loop header
LB: loop body
LE: loop exit
PB: predicated region body
PF: predicated region fallthrough
CT: control target
= control target key end

     0   :  { %s384_s20 = smov 0   ;;  %s414_s0 = inlined_call_operand.vmem [shape: f32[2,4,128], index: 0, kind: input, shape index: {}]   ;;  %s415_s1 = inlined_call_operand.vmem [shape: f32[1,128], index: 1, kind: input, shape index: {}]   ;;  %s416_s2 = inlined_call_operand.vmem [shape: f32[1,128], index: 2, kind: input, shape index: {}]   ;;  %s417_s3 = inlined_call_operand.vmem [shape: f32[1,128], index: 3, kind: input, shape index: {}]   ;;  %s418_s4 = inlined_call_operand.<no memory space> [shape: f32[1,1], index: 4, kind: input, shape index: {}]   ;;  %s419_s5 = inlined_call_operand.vmem [shape: f32[2,1,1], index: 5, kind: output, shape index: {}]  }
   0x1   :  { %v10_v0 = vstv %s418_s4 }
   0x2   :  { %11 = vst [vmem:[#allocation2] sm:$0x1] %v10_v0 }
   0x3 LB: > { %s317_s21 = sadd.s32 4294967295, %s349_s20   ;;  %p321_p0 = scmp.ge.s32.totalorder %s349_s20, 1  ;;  %s349_s20 = sphi %s384_s20, %s17_s20  }
   0x4   : > { %p188_p1 = scmp.lt.s32.totalorder %s349_s20, 3 }
   0x6   : > { %p189_p2 = pnand %p321_p0, %p188_p1 }
   0x7   : > { %p213_p3 = scmp.lt.s32.totalorder (!%p189_p2), %s317_s21, 1 }
   0x8   : > { %192 = sbr.rel (%p189_p2) target bundleno = 250 (0xfa), region = 40 }
   0xd   : > { %s421_s21 = smov (!%p213_p3, %s317_s21), 1  ;;  %v323_v1 = vld [vmem:[%s415_s1] ss:$0 sm:$0xff]  ;;  %vm244_vm0 = vcmask 1043456   ;;  %vm254_vm1 = vcmask 1040384   ;;  %vm268_vm2 = vcmask 0  }
   0xe   : > { %s322_s4 = sshll.u32 %s421_s21, 2  ;;  %v324_v3 = vld [vmem:[%s416_s2] ss:$0 sm:$0xff]  ;;  %s219_s8 = scalar_lea.vmem %s419_s5, %s421_s21 }
   0xf   : > { %s216_s26 = scalar_lea.vmem %s414_s0, %s322_s4  ;;  %v252_v18 = vld [vmem:[%s417_s3] sm:$0x1] }
  0x10   : > { %v220_v2 = vld [vmem:[%s216_s26] sm:$0xf] }
  0x11   : > { %v228_v4 = vmul.f32 %v323_v1, %v220_v2  ;;  %v260_v23 = vld [vmem:[#allocation2] sm:$0x1] }
  0x13   : > { %v236_v5 = vadd.f32 %v324_v3, %v228_v4 }
  0x15   : > { %v237_v6 = vsub.f32 0.0, %v236_v5 }
  0x17   : > { %v238_v7 = vmul.f32 1.442695, %v237_v6 }
  0x19   : > { %335 = vpow2.f32 %v238_v7 }
  0x26   : > { %v336_v8 = vpop.eup %335 }
  0x27   : > { %v240_v9 = vadd.f32 1.0, %v336_v8 }
  0x29   : > { %337 = vrcp.f32 %v240_v9 }
  0x36   : > { %v338_v10 = vpop.eup %337 }
  0x37   : > { %v243_v11 = vmul.f32 %v338_v10, %v236_v5 }
  0x39   : > { %v245_v12 = vsel %vm244_vm0, %v243_v11, 0.0 }
  0x3a   : > { %v246_v13 = vrot.slane %v245_v12, 4 }
  0x3c   : > { %v247_v14 = vadd.f32 %v246_v13, %v245_v12 }
  0x3e   : > { %v248_v15 = vrot.slane %v247_v14, 2 }
  0x40   : > { %v249_v16 = vadd.f32 %v248_v15, %v247_v14 }
  0x42   : > { %v250_v17 = vrot.slane %v249_v16, 1 }
  0x44   : > { %v251_v19 = vadd.f32 %v250_v17, %v249_v16 }
  0x46   : > { %v253_v20 = vmul.f32 %v252_v18, %v251_v19 }
  0x48   : > { %v255_v21 = vsel %vm254_vm1, %v253_v20, 0.0 }
  0x49   : > { %256 = vadd.xlane.f32.xlu0 %v255_v21 }
  0xd2   : > { %v257_v22 = vpop.xlane.xlu0 %256 }
  0xd3   : > { %v259_v24 = vmul.f32 0.0625, %v257_v22 }
  0xd5   : > { %v261_v25 = vadd.f32 %v260_v23, %v259_v24 }
  0xd7   : > { %v262_v26 = vsub.f32 0.0, %v261_v25 }
  0xd9   : > { %v263_v27 = vmul.f32 1.442695, %v262_v26 }
  0xdb   : > { %339 = vpow2.f32 %v263_v27 }
  0xe8   : > { %v340_v28 = vpop.eup %339 }
  0xe9   : > { %v265_v29 = vadd.f32 1.0, %v340_v28 }
  0xeb   : > { %341 = vrcp.f32 %v265_v29 }
  0xf8   : > { %v342_v30 = vpop.eup %341 }
  0xf9   : > { %269 = vst.msk [vmem:[%s219_s8] sm:$0x1] %vm268_vm2, %v342_v30 }
  0xfa PF: > { %s17_s20 = sadd.s32 1, %s349_s20  }
  0xfb   : > { %p14_p4 = scmp.ge.s32.totalorder %s17_s20, 4  }
  0xfd   :  { %16 = sbr.rel (!%p14_p4) target bundleno = 3 (0x3), region = 70 }

// kernel: discriminator_forward.5
= control target key start
LH: loop header
LB: loop body
LE: loop exit
PB: predicated region body
PF: predicated region fallthrough
CT: control target
= control target key end

     0   :  { %s1091_s21 = smov 0   ;;  %s1311_s0 = inlined_call_operand.vmem [shape: f32[2,8,8,32], index: 0, kind: input, shape index: {}]   ;;  %s1312_s1 = inlined_call_operand.vmem [shape: f32[288,64], index: 1, kind: input, shape index: {}]   ;;  %s1313_s2 = inlined_call_operand.vmem [shape: f32[1,64], index: 2, kind: input, shape index: {}]   ;;  %s1314_s3 = inlined_call_operand.vmem [shape: f32[1,32], index: 3, kind: input, shape index: {}]   ;;  %s1315_s4 = inlined_call_operand.vmem [shape: f32[1,32], index: 4, kind: input, shape index: {}]   ;;  %s1316_s5 = inlined_call_operand.vmem [shape: f32[2,16,64], index: 5, kind: output, shape index: {0}]   ;;  %s1317_s6 = inlined_call_operand.vmem [shape: f32[2,2,64], index: 6, kind: output, shape index: {1}]  }
   0x1 LB: > { %s896_s22 = sadd.s32 4294967295, %s1050_s21   ;;  %p900_p0 = scmp.ge.s32.totalorder %s1050_s21, 1  ;;  %s1050_s21 = sphi %s1091_s21, %s17_s21  }
   0x2   : > { %p215_p1 = scmp.lt.s32.totalorder %s1050_s21, 3 }
   0x4   : > { %p216_p2 = pnand %p900_p0, %p215_p1 }
   0x5   : > { %p249_p3 = scmp.lt.s32.totalorder (!%p216_p2), %s896_s22, 1  ;;  %s1053_s7 = smov (!%p216_p2), 32  }
   0x6   : > { %219 = sbr.rel (%p216_p2) target bundleno = 419 (0x1a3), region = 40  ;;  %s1054_s8 = smov (!%p216_p2), 96  }
   0xb   : > { %vm357_vm0 = vcmask 261120   ;;  %vm359_vm1 = vcmask 254976   ;;  %v597_v0 = vld [vmem:[%s1312_s1 + $0xf8] sm:$0xff]  ;;  %s1319_s22 = smov (!%p249_p3, %s896_s22), 1  ;;  %v1052_v2 = vmov 0.0   ;;  %v596_v3 = vld [vmem:[%s1312_s1 + $0xf0] sm:$0xff] }
   0xc   : > { %v581_v1 = vld [vmem:[%s1312_s1 + $0x78] sm:$0xff]  ;;  %358 = vst.msk [vmem:[#allocation2] sm:$0xff] %vm357_vm0, %v1052_v2  ;;  %361 = vst.msk [vmem:[#allocation2 + $0x10] sm:$0xff] %vm357_vm0, %v1052_v2  ;;  %915 = vmatprep.subr.mxu0 %v597_v0  ;;  %v580_v4 = vld [vmem:[%s1312_s1 + $0x70] sm:$0xff]  ;;  %s913_s9 = sshll.u32 %s1319_s22, 6  ;;  %vm554_vm2 = vcmask 523264  }
   0xd   : > { %362 = vst.msk [vmem:[#allocation2 + $0x18] sm:$0x3] %vm359_vm1, %v1052_v2  ;;  %364 = vst.msk [vmem:[#allocation2 + $0x28] sm:$0x3] %vm359_vm1, %v1052_v2  ;;  %916 = vmatpush3.msra.mxu0 %v581_v1  ;;  %v595_v5 = vld [vmem:[%s1312_s1 + $0xe8] sm:$0xff]  ;;  %s253_s18 = scalar_lea.vmem %s1311_s0, %s913_s9  ;;  %v594_v9 = vld [vmem:[%s1312_s1 + $0xe0] sm:$0xff] }
   0xe   : > { %363 = vst.msk [vmem:[#allocation2 + $0x20] sm:$0xff] %vm357_vm0, %v1052_v2  ;;  %365 = vst.msk [vmem:[#allocation2 + $0x30] sm:$0xff] %vm357_vm0, %v1052_v2  ;;  %v906_v6 = vld [vmem:[%s1314_s3] ss:$0 sm:$0xff]  ;;  %917 = vmatprep.subr.mxu0 %v596_v3  ;;  %v579_v8 = vld [vmem:[%s1312_s1 + $0x68] sm:$0xff]  ;;  %s1055_s9 = smov 64  }
   0xf   : > { %366 = vst.msk [vmem:[#allocation2 + $0x38] sm:$0x3] %vm359_vm1, %v1052_v2  ;;  %360 = vst.msk [vmem:[#allocation2 + $0x8] sm:$0x3] %vm359_vm1, %v1052_v2  ;;  %v907_v7 = vld [vmem:[%s1315_s4] ss:$0 sm:$0xff]  ;;  %918 = vmatpush3.msra.mxu0 %v580_v4 }
  0x10   : > { %367 = vst.msk [vmem:[#allocation2 + $0x40] sm:$0xff] %vm357_vm0, %v1052_v2  ;;  %369 = vst.msk [vmem:[#allocation2 + $0x50] sm:$0xff] %vm357_vm0, %v1052_v2  ;;  %v578_v10 = vld [vmem:[%s1312_s1 + $0x60] sm:$0xff]  ;;  %v593_v11 = vld [vmem:[%s1312_s1 + $0xd8] sm:$0xff]  ;;  %919 = vmatprep.subr.mxu0 %v595_v5  ;;  %vm557_vm3 = vcmask 785408   ;;  %s905_s24 = sshll.u32 %s1319_s22, 1 }
  0x11   : > { %368 = vst.msk [vmem:[#allocation2 + $0x48] sm:$0x3] %vm359_vm1, %v1052_v2  ;;  %370 = vst.msk [vmem:[#allocation2 + $0x58] sm:$0x3] %vm359_vm1, %v1052_v2  ;;  %v263_v12 = vld [vmem:[%s253_s18] sm:$0xff]  ;;  %v264_v13 = vld [vmem:[%s253_s18 + $0x8] sm:$0xff]  ;;  %920 = vmatpush3.msra.mxu0 %v579_v8  ;;  %s262_s27 = scalar_lea.vmem %s1317_s6, %s905_s24 }
  0x12   : > { %371 = vst.msk [vmem:[#allocation2 + $0x60] sm:$0xff] %vm357_vm0, %v1052_v2  ;;  %373 = vst.msk [vmem:[#allocation2 + $0x70] sm:$0xff] %vm357_vm0, %v1052_v2  ;;  %v265_v14 = vld [vmem:[%s253_s18 + $0x10] sm:$0xff]  ;;  %v278_v15 = vmul.f32 %v906_v6, %v263_v12  ;;  %v279_v16 = vmul.f32 %v906_v6, %v264_v13  ;;  %v266_v18 = vld [vmem:[%s253_s18 + $0x18] sm:$0xff]  ;;  %921 = vmatprep.subr.mxu0 %v594_v9  ;;  %vm774_vm4 = vcmask 516096  }
  0x13   : > { %372 = vst.msk [vmem:[#allocation2 + $0x68] sm:$0x3] %vm359_vm1, %v1052_v2  ;;  %374 = vst.msk [vmem:[#allocation2 + $0x78] sm:$0x3] %vm359_vm1, %v1052_v2  ;;  %v280_v17 = vmul.f32 %v906_v6, %v265_v14  ;;  %v267_v19 = vld [vmem:[%s253_s18 + $0x20] sm:$0xff]  ;;  %v268_v20 = vld [vmem:[%s253_s18 + $0x28] sm:$0xff]  ;;  %v281_v21 = vmul.f32 %v906_v6, %v266_v18  ;;  %922 = vmatpush3.msra.mxu0 %v578_v10 }
  0x14   : > { %375 = vst.msk [vmem:[#allocation2 + $0x80] sm:$0xff] %vm357_vm0, %v1052_v2  ;;  %v269_v22 = vld [vmem:[%s253_s18 + $0x30] sm:$0xff]  ;;  %v282_v23 = vmul.f32 %v906_v6, %v267_v19  ;;  %v283_v24 = vmul.f32 %v906_v6, %v268_v20  ;;  %v270_v25 = vld [vmem:[%s253_s18 + $0x38] sm:$0xff]  ;;  %v1159_v27 = vadd.f32 %v907_v7, %v278_v15  ;;  %v1161_v28 = vadd.f32 %v907_v7, %v279_v16  ;;  %v591_v41 = vld [vmem:[%s1312_s1 + $0xc8] sm:$0xff]  ;;  %s914_s18 = sshll.u32 %s1319_s22, 4 }
  0x15   : > { %376 = vst.msk [vmem:[#allocation2 + $0x88] sm:$0x3] %vm359_vm1, %v1052_v2  ;;  %v577_v26 = vld [vmem:[%s1312_s1 + $0x58] sm:$0xff]  ;;  %v1163_v29 = vadd.f32 %v907_v7, %v280_v17  ;;  %v284_v30 = vmul.f32 %v906_v6, %v269_v22  ;;  %v592_v31 = vld [vmem:[%s1312_s1 + $0xd0] sm:$0xff]  ;;  %v1168_v32 = vadd.f32 %v907_v7, %v281_v21  ;;  %v285_v35 = vmul.f32 %v906_v6, %v270_v25  ;;  %v575_v46 = vld [vmem:[%s1312_s1 + $0x48] sm:$0xff]  ;;  %s258_s23 = scalar_lea.vmem %s1316_s5, %s914_s18 }
  0x16   : > { %v1170_v33 = vadd.f32 %v907_v7, %v282_v23  ;;  %v1172_v34 = vadd.f32 %v907_v7, %v283_v24  ;;  %923 = vmatprep.subr.mxu0 %v593_v11  ;;  %v576_v36 = vld [vmem:[%s1312_s1 + $0x50] sm:$0xff]  ;;  %v301_v37 = vsub.f32 0.0, %v1159_v27  ;;  %v302_v38 = vsub.f32 0.0, %v1161_v28  ;;  %v590_v47 = vld [vmem:[%s1312_s1 + $0xc0] sm:$0xff]  ;;  %v589_v56 = vld [vmem:[%s1312_s1 + $0xb8] sm:$0xff] }
  0x17   : > { %v303_v39 = vsub.f32 0.0, %v1163_v29  ;;  %v1180_v40 = vadd.f32 %v907_v7, %v284_v30  ;;  %924 = vmatpush3.msra.mxu0 %v577_v26  ;;  %v304_v42 = vsub.f32 0.0, %v1168_v32  ;;  %v1188_v45 = vadd.f32 %v907_v7, %v285_v35  ;;  %v574_v54 = vld [vmem:[%s1312_s1 + $0x40] sm:$0xff]  ;;  %v573_v58 = vld [vmem:[%s1312_s1 + $0x38] sm:$0xff]  ;;  %v588_v60 = vld [vmem:[%s1312_s1 + $0xb0] sm:$0xff] }
  0x18   : > { %v305_v43 = vsub.f32 0.0, %v1170_v33  ;;  %v306_v44 = vsub.f32 0.0, %v1172_v34  ;;  %925 = vmatprep.subr.mxu0 %v592_v31  ;;  %v309_v48 = vmul.f32 1.442695, %v301_v37  ;;  %v311_v49 = vmul.f32 1.442695, %v302_v38 }
  0x19   : > { %v313_v50 = vmul.f32 1.442695, %v303_v39  ;;  %926 = vmatpush3.msra.mxu0 %v576_v36  ;;  %v315_v51 = vmul.f32 1.442695, %v304_v42  ;;  %v307_v52 = vsub.f32 0.0, %v1180_v40  ;;  %v308_v53 = vsub.f32 0.0, %v1188_v45 }
  0x1a   : > { %927 = vmatprep.subr.mxu0 %v591_v41  ;;  %1012 = vpow2.f32 %v309_v48  ;;  %v317_v55 = vmul.f32 1.442695, %v305_v43  ;;  %v319_v57 = vmul.f32 1.442695, %v306_v44  ;;  %v572_v62 = vld [vmem:[%s1312_s1 + $0x30] sm:$0xff]  ;;  %v587_v63 = vld [vmem:[%s1312_s1 + $0xa8] sm:$0xff] }
  0x1b   : > { %928 = vmatpush3.msra.mxu0 %v575_v46  ;;  %1014 = vpow2.f32 %v311_v49  ;;  %v321_v59 = vmul.f32 1.442695, %v307_v52  ;;  %v323_v61 = vmul.f32 1.442695, %v308_v53  ;;  %v571_v0 = vld [vmem:[%s1312_s1 + $0x28] sm:$0xff]  ;;  %v586_v1 = vld [vmem:[%s1312_s1 + $0xa0] sm:$0xff] }
  0x1c   : > { %929 = vmatprep.subr.mxu0 %v590_v47  ;;  %1016 = vpow2.f32 %v313_v50  ;;  %v570_v25 = vld [vmem:[%s1312_s1 + $0x20] sm:$0xff]  ;;  %v569_v31 = vld [vmem:[%s1312_s1 + $0x18] sm:$0xff]  ;;  %v584_v35 = vld [vmem:[%s1312_s1 + $0x90] sm:$0xff] }
  0x1d   : > { %930 = vmatpush3.msra.mxu0 %v574_v54  ;;  %1018 = vpow2.f32 %v315_v51  ;;  %v396_v39 = vld [vmem:[#allocation2 + $0x1] ss:$2 sm:$0xf]  ;;  %v404_v42 = vld [vmem:[#allocation2 + $0x2] ss:$2 sm:$0xf] }
  0x1e   : > { %931 = vmatprep.subr.mxu0 %v589_v56  ;;  %1020 = vpow2.f32 %v317_v55  ;;  %v567_v43 = vld [vmem:[%s1312_s1 + $0x8] sm:$0xff]  ;;  %v582_v44 = vld [vmem:[%s1312_s1 + $0x80] sm:$0xff] }
  0x1f   : > { %932 = vmatpush3.msra.mxu0 %v573_v58  ;;  %1022 = vpow2.f32 %v319_v57 }
  0x20   : > { %933 = vmatprep.subr.mxu0 %v588_v60  ;;  %1024 = vpow2.f32 %v321_v59 }
  0x21   : > { %934 = vmatpush3.msra.mxu0 %v572_v62  ;;  %1026 = vpow2.f32 %v323_v61 }
  0x22   : > { %935 = vmatprep.subr.mxu0 %v587_v63 }
  0x23   : > { %936 = vmatpush3.msra.mxu0 %v571_v0 }
  0x24   : > { %937 = vmatprep.subr.mxu0 %v586_v1 }
  0x25   : > { %938 = vmatpush3.msra.mxu0 %v570_v25 }
  0x27   : > { %v1013_v2 = vpop.eup %1012 }
  0x28   : > { %v1015_v3 = vpop.eup %1014  ;;  %v325_v4 = vadd.f32 1.0, %v1013_v2 }
  0x29   : > { %v1017_v5 = vpop.eup %1016  ;;  %v326_v6 = vadd.f32 1.0, %v1015_v3 }
  0x2a   : > { %v1019_v7 = vpop.eup %1018  ;;  %v327_v8 = vadd.f32 1.0, %v1017_v5  ;;  %1028 = vrcp.f32 %v325_v4 }
  0x2b   : > { %v1021_v9 = vpop.eup %1020  ;;  %1030 = vrcp.f32 %v326_v6  ;;  %v328_v10 = vadd.f32 1.0, %v1019_v7 }
  0x2c   : > { %v1023_v11 = vpop.eup %1022  ;;  %1032 = vrcp.f32 %v327_v8  ;;  %v329_v12 = vadd.f32 1.0, %v1021_v9 }
  0x2d   : > { %v1025_v13 = vpop.eup %1024  ;;  %1034 = vrcp.f32 %v328_v10  ;;  %v330_v14 = vadd.f32 1.0, %v1023_v11 }
  0x2e   : > { %v1027_v15 = vpop.eup %1026  ;;  %v331_v16 = vadd.f32 1.0, %v1025_v13  ;;  %1036 = vrcp.f32 %v329_v12 }
  0x2f   : > { %1038 = vrcp.f32 %v330_v14  ;;  %v332_v17 = vadd.f32 1.0, %v1027_v15 }
  0x30   : > { %1040 = vrcp.f32 %v331_v16 }
  0x31   : > { %1042 = vrcp.f32 %v332_v17 }
  0x37   : > { %v1029_v18 = vpop.eup %1028 }
  0x38   : > { %v1031_v19 = vpop.eup %1030  ;;  %v349_v20 = vmul.f32 %v1029_v18, %v1159_v27  ;;  %v585_v27 = vld [vmem:[%s1312_s1 + $0x98] sm:$0xff] }
  0x39   : > { %v1033_v21 = vpop.eup %1032  ;;  %v350_v22 = vmul.f32 %v1031_v19, %v1161_v28  ;;  %939 = vmatprep.subr.mxu0 %v585_v27 }
  0x3a   : > { %v1035_v23 = vpop.eup %1034  ;;  %v351_v24 = vmul.f32 %v1033_v21, %v1163_v29  ;;  %380 = vst.msk [vmem:[#allocation2 + $0x11] sm:$0xff] %vm357_vm0, %v349_v20  ;;  %940 = vmatpush3.msra.mxu0 %v569_v31  ;;  %v566_v21 = vld [vmem:[%s1312_s1] sm:$0xff] }
  0x3b   : > { %v1037_v26 = vpop.eup %1036  ;;  %381 = vst.msk [vmem:[#allocation2 + $0x21] sm:$0xff] %vm357_vm0, %v350_v22  ;;  %v352_v30 = vmul.f32 %v1035_v23, %v1168_v32  ;;  %941 = vmatprep.subr.mxu0 %v584_v35  ;;  %v599_v22 = vld [vmem:[%s1312_s1 + $0x108] sm:$0xff]  ;;  %v388_v35 = vld [vmem:[#allocation2] ss:$2 sm:$0xf] }
  0x3c   : > { %v1039_v28 = vpop.eup %1038  ;;  %382 = vst.msk [vmem:[#allocation2 + $0x31] sm:$0xff] %vm357_vm0, %v351_v24  ;;  %v353_v29 = vmul.f32 %v1037_v26, %v1170_v33  ;;  %v568_v33 = vld [vmem:[%s1312_s1 + $0x10] sm:$0xff]  ;;  %v598_v24 = vld [vmem:[%s1312_s1 + $0x100] sm:$0xff] }
  0x3d   : > { %v1041_v32 = vpop.eup %1040  ;;  %383 = vst.msk [vmem:[#allocation2 + $0x41] sm:$0xff] %vm357_vm0, %v352_v30  ;;  %v354_v36 = vmul.f32 %v1039_v28, %v1172_v34  ;;  %942 = vmatpush3.msra.mxu0 %v568_v33  ;;  %v583_v34 = vld [vmem:[%s1312_s1 + $0x88] sm:$0xff] }
  0x3e   : > { %v1043_v37 = vpop.eup %1042  ;;  %v355_v38 = vmul.f32 %v1041_v32, %v1180_v40  ;;  %384 = vst.msk [vmem:[#allocation2 + $0x51] sm:$0xff] %vm357_vm0, %v353_v29  ;;  %v601_v40 = vld [vmem:[%s1312_s1 + $0x118] sm:$0xff]  ;;  %943 = vmatprep.subr.mxu0 %v583_v34 }
  0x3f   : > { %385 = vst.msk [vmem:[#allocation2 + $0x61] sm:$0xff] %vm357_vm0, %v354_v36  ;;  %v356_v41 = vmul.f32 %v1043_v37, %v1188_v45  ;;  %959 = vmatprep.subr.mxu1 %v601_v40  ;;  %v600_v45 = vld [vmem:[%s1312_s1 + $0x110] sm:$0xff]  ;;  %944 = vmatpush3.msra.mxu0 %v567_v43 }
  0x40   : > { %386 = vst.msk [vmem:[#allocation2 + $0x71] sm:$0xff] %vm357_vm0, %v355_v38  ;;  %960 = vmatpush3.msra.mxu1 %v601_v40  ;;  %945 = vmatprep.subr.mxu0 %v582_v44 }
  0x41   : > { %v427_v46 = vld [vmem:[#allocation2 + $0x12] ss:$2 sm:$0xf]  ;;  %387 = vst.msk [vmem:[#allocation2 + $0x81] sm:$0xff] %vm357_vm0, %v356_v41  ;;  %961 = vmatprep.subr.mxu1 %v600_v45  ;;  %946 = vmatpush3.msra.mxu0 %v566_v21 }
  0x42   : > { %v411_v47 = vld [vmem:[#allocation2 + $0x10] ss:$2 sm:$0xf]  ;;  %v398_v48 = vld [vmem:[#allocation2 + $0x21] ss:$2 sm:$0xf]  ;;  %962 = vmatpush3.msra.mxu1 %v600_v45 }
  0x43   : > { %v443_v49 = vld [vmem:[#allocation2 + $0x21] ss:$2 sm:$0xf]  ;;  %v429_v50 = vld [vmem:[#allocation2 + $0x32] ss:$2 sm:$0xf]  ;;  %v470_v51 = vcombine.low %v396_v39, %v398_v48  ;;  %963 = vmatprep.subr.mxu1 %v599_v22 }
  0x44   : > { %v413_v52 = vld [vmem:[#allocation2 + $0x30] ss:$2 sm:$0xf]  ;;  %v514_v53 = vcombine.low %v427_v46, %v429_v50  ;;  %v445_v54 = vld [vmem:[#allocation2 + $0x41] ss:$2 sm:$0xf]  ;;  %964 = vmatpush3.msra.mxu1 %v599_v22 }
  0x45   : > { %v494_v55 = vcombine.low %v411_v47, %v413_v52  ;;  %v406_v56 = vld [vmem:[#allocation2 + $0x22] ss:$2 sm:$0xf]  ;;  %v538_v57 = vcombine.low %v443_v49, %v445_v54  ;;  %v400_v63 = vld [vmem:[#allocation2 + $0x41] ss:$2 sm:$0xf]  ;;  %965 = vmatprep.subr.mxu1 %v598_v24 }
  0x46   : > { %v435_v58 = vld [vmem:[#allocation2 + $0x20] ss:$2 sm:$0xf]  ;;  %v482_v60 = vcombine.low %v404_v42, %v406_v56  ;;  %v982_v61 = vpack.i.bf16 %v470_v51, %v514_v53  ;;  %v402_v0 = vld [vmem:[#allocation2 + $0x61] ss:$2 sm:$0xf]  ;;  %966 = vmatpush3.msra.mxu1 %v598_v24 }
  0x47   : > { %v437_v59 = vld [vmem:[#allocation2 + $0x40] ss:$2 sm:$0xf]  ;;  %v992_v1 = vpack.i.bf16 %v494_v55, %v538_v57  ;;  %v431_v2 = vld [vmem:[#allocation2 + $0x52] ss:$2 sm:$0xf]  ;;  %v471_v4 = vcombine.low %v400_v63, %v402_v0 }
  0x48   : > { %v526_v62 = vcombine.low %v435_v58, %v437_v59  ;;  %v433_v3 = vld [vmem:[#allocation2 + $0x72] ss:$2 sm:$0xf]  ;;  %983 = vrot.lane.b32.xlu0 %v982_v61, %s1053_s7  ;;  %v408_v7 = vld [vmem:[#allocation2 + $0x42] ss:$2 sm:$0xf] }
  0x49   : > { %v515_v6 = vcombine.low %v431_v2, %v433_v3  ;;  %v410_v8 = vld [vmem:[#allocation2 + $0x62] ss:$2 sm:$0xf]  ;;  %993 = vrot.lane.b32.xlu1 %v992_v1, %s1054_s8  ;;  %v415_v14 = vld [vmem:[#allocation2 + $0x50] ss:$2 sm:$0xf] }
  0x4a   : > { %v987_v5 = vpack.i.bf16 %v482_v60, %v526_v62  ;;  %v439_v9 = vld [vmem:[#allocation2 + $0x60] ss:$2 sm:$0xf]  ;;  %v483_v11 = vcombine.low %v408_v7, %v410_v8  ;;  %v417_v15 = vld [vmem:[#allocation2 + $0x70] ss:$2 sm:$0xf] }
  0x4b   : > { %v441_v10 = vld [vmem:[#allocation2 + $0x80] ss:$2 sm:$0xf]  ;;  %v997_v12 = vpack.i.bf16 %v471_v4, %v515_v6  ;;  %v447_v16 = vld [vmem:[#allocation2 + $0x61] ss:$2 sm:$0xf]  ;;  %v495_v18 = vcombine.low %v415_v14, %v417_v15 }
  0x4c   : > { %v527_v13 = vcombine.low %v439_v9, %v441_v10  ;;  %v449_v17 = vld [vmem:[#allocation2 + $0x81] ss:$2 sm:$0xf]  ;;  %988 = vrot.lane.b32.xlu0 %v987_v5, %s1055_s9  ;;  %v451_v25 = vld [vmem:[#allocation2 + $0x22] ss:$2 sm:$0xf] }
  0x4d   : > { %v539_v20 = vcombine.low %v447_v16, %v449_v17  ;;  %998 = vrot.lane.b32.xlu1 %v997_v12, %s1053_s7  ;;  %v453_v26 = vld [vmem:[#allocation2 + $0x42] ss:$2 sm:$0xf]  ;;  %v419_v31 = vld [vmem:[#allocation2 + $0x11] ss:$2 sm:$0xf] }
  0x4e   : > { %v1002_v19 = vpack.i.bf16 %v483_v11, %v527_v13  ;;  %v550_v30 = vcombine.low %v451_v25, %v453_v26  ;;  %v455_v27 = vld [vmem:[#allocation2 + $0x62] ss:$2 sm:$0xf]  ;;  %v421_v32 = vld [vmem:[#allocation2 + $0x31] ss:$2 sm:$0xf] }
  0x4f   : > { %v1007_v23 = vpack.i.bf16 %v495_v18, %v539_v20  ;;  %v457_v28 = vld [vmem:[#allocation2 + $0x82] ss:$2 sm:$0xf]  ;;  %v423_v38 = vld [vmem:[#allocation2 + $0x51] ss:$2 sm:$0xf]  ;;  %v506_v43 = vcombine.low %v419_v31, %v421_v32 }
  0x50   : > { %1003 = vrot.lane.b32.xlu0 %v1002_v19, %s1055_s9  ;;  %967 = vmatprep.mubr.msk.f32.mxu1 %vm357_vm0, %v550_v30  ;;  %v551_v29 = vcombine.low %v455_v27, %v457_v28  ;;  %v390_v36 = vld [vmem:[#allocation2 + $0x20] ss:$2 sm:$0xf]  ;;  %v425_v33 = vld [vmem:[#allocation2 + $0x71] ss:$2 sm:$0xf] }
  0x51   : > { %1008 = vrot.lane.b32.xlu1 %v1007_v23, %s1054_s8  ;;  %v392_v41 = vld [vmem:[#allocation2 + $0x40] ss:$2 sm:$0xf]  ;;  %v462_v44 = vcombine.low %v388_v35, %v390_v36  ;;  %v507_v46 = vcombine.low %v423_v38, %v425_v33 }
  0x52   : > { %968 = vmatmul.mubr.msk.f32.vlgmr.msra.gmra.mxu1 %vm357_vm0, %v551_v29  ;;  %v394_v34 = vld [vmem:[#allocation2 + $0x60] ss:$2 sm:$0xf] }
  0x53   : > { %v463_v47 = vcombine.low %v392_v41, %v394_v34  ;;  %v908_v12 = vld [vmem:[%s1313_s2] ss:$0 sm:$0xff] }
  0xba   : > { %v984_v37 = vpop.permute.xlu0 %983 }
  0xbb   : > { %v994_v39 = vpop.permute.xlu1 %993  ;;  %v986_v40 = vunpack.i.h.bf16 %v984_v37  ;;  %v985_v42 = vunpack.i.l.bf16 %v984_v37 }
  0xbc   : > { %v996_v48 = vunpack.i.h.bf16 %v994_v39  ;;  %v995_v49 = vunpack.i.l.bf16 %v994_v39 }
  0xbd   : > { %v560_v55 = vsel %vm357_vm0, %v506_v43, %v985_v42  ;;  %v552_v56 = vsel %vm357_vm0, %v462_v44, %v986_v40 }
  0xbe   : > { %v989_v45 = vpop.permute.xlu0 %988 }
  0xbf   : > { %v991_v50 = vunpack.i.h.bf16 %v989_v45  ;;  %v990_v51 = vunpack.i.l.bf16 %v989_v45  ;;  %v999_v52 = vpop.permute.xlu1 %998 }
  0xc0   : > { %v1001_v53 = vunpack.i.h.bf16 %v999_v52  ;;  %v1000_v54 = vunpack.i.l.bf16 %v999_v52 }
  0xc1   : > { %v562_v57 = vsel %vm554_vm2, %v560_v55, %v990_v51  ;;  %v555_v58 = vsel %vm554_vm2, %v552_v56, %v991_v50 }
  0xc2   : > { %v1004_v59 = vpop.permute.xlu0 %1003  ;;  %v564_v60 = vsel %vm557_vm3, %v562_v57, %v995_v49  ;;  %v558_v61 = vsel %vm557_vm3, %v555_v58, %v996_v48  ;;  %v561_v3 = vsel %vm357_vm0, %v507_v46, %v1000_v54  ;;  %v553_v4 = vsel %vm357_vm0, %v463_v47, %v1001_v53 }
  0xc3   : > { %v1006_v62 = vunpack.i.h.bf16 %v1004_v59  ;;  %v1005_v63 = vunpack.i.l.bf16 %v1004_v59  ;;  %v1009_v0 = vpop.permute.xlu1 %1008  ;;  %677 = vmatprep.mubr.f32.mxu0 %v564_v60 }
  0xc4   : > { %v1011_v1 = vunpack.i.h.bf16 %v1009_v0  ;;  %v1010_v2 = vunpack.i.l.bf16 %v1009_v0  ;;  %678 = vmatmul.mubr.f32.vlgmr.msra.gmra.mxu0 %v558_v61 }
  0xc5   : > { %v563_v5 = vsel %vm554_vm2, %v561_v3, %v1005_v63  ;;  %v556_v6 = vsel %vm554_vm2, %v553_v4, %v1006_v62 }
  0xc6   : > { %v565_v7 = vsel %vm557_vm3, %v563_v5, %v1010_v2  ;;  %v559_v8 = vsel %vm557_vm3, %v556_v6, %v1011_v1 }
  0xc7   : > { %682 = vmatprep.mubr.f32.mxu0 %v565_v7 }
  0xc8   : > { %683 = vmatmul.mubr.f32.gmra.mxu0 %v559_v8 }
 0x112   : > { %v969_v10 = vpop.f32.mrf.mxu1 }
 0x114   : > { %v754_v15 = vpop.f32.mrf.mxu1 }
 0x184   : > { %v947_v9 = vpop.f32.mrf.mxu0 }
 0x186   : > { %v948_v11 = vpop.f32.mrf.mxu0 }
 0x187   : > { %v949_v13 = vadd.f32 %v948_v11, %v947_v9 }
 0x188   : > { %v950_v14 = vpop.f32.mrf.mxu0 }
 0x189   : > { %v680_v16 = vadd.f32 %v949_v13, %v908_v12 }
 0x18a   : > { %v951_v17 = vpop.f32.mrf.mxu0 }
 0x18b   : > { %v952_v18 = vadd.f32 %v951_v17, %v950_v14  ;;  %v755_v19 = vadd.f32 %v754_v15, %v680_v16 }
 0x18d   : > { %v685_v20 = vadd.f32 %v952_v18, %v908_v12  ;;  %763 = vst.msk [vmem:[%s258_s23] sm:$0xff] %vm554_vm2, %v755_v19  ;;  %v776_v22 = vmul.f32 %v755_v19, %v755_v19  ;;  %v765_v24 = vsel %vm554_vm2, %v755_v19, 0.0 }
 0x18f   : > { %v760_v21 = vadd.f32 %v969_v10, %v685_v20  ;;  %v778_v30 = vsel %vm554_vm2, %v776_v22, 0.0 }
 0x191   : > { %v777_v23 = vmul.f32 %v760_v21, %v760_v21  ;;  %764 = vst.msk [vmem:[%s258_s23 + $0x8] sm:$0xff] %vm554_vm2, %v760_v21  ;;  %v766_v25 = vsel %vm554_vm2, %v760_v21, 0.0 }
 0x192   : > { %v767_v26 = vadd.f32 %v766_v25, %v765_v24 }
 0x193   : > { %v779_v27 = vsel %vm554_vm2, %v777_v23, 0.0 }
 0x194   : > { %v768_v28 = vrot.slane %v767_v26, 4  ;;  %v780_v29 = vadd.f32 %v779_v27, %v778_v30 }
 0x196   : > { %v769_v31 = vadd.f32 %v768_v28, %v767_v26  ;;  %v781_v35 = vrot.slane %v780_v29, 4 }
 0x198   : > { %v770_v32 = vrot.slane %v769_v31, 2  ;;  %v782_v36 = vadd.f32 %v781_v35, %v780_v29 }
 0x19a   : > { %v771_v37 = vadd.f32 %v770_v32, %v769_v31  ;;  %v783_v38 = vrot.slane %v782_v36, 2 }
 0x19c   : > { %v772_v33 = vrot.slane %v771_v37, 1  ;;  %v784_v39 = vadd.f32 %v783_v38, %v782_v36 }
 0x19e   : > { %v773_v41 = vadd.f32 %v772_v33, %v771_v37  ;;  %v785_v34 = vrot.slane %v784_v39, 1 }
 0x1a0   : > { %775 = vst.msk [vmem:[%s262_s27] sm:$0x1] %vm774_vm4, %v773_v41  ;;  %v786_v40 = vadd.f32 %v785_v34, %v784_v39 }
 0x1a2   : > { %787 = vst.msk [vmem:[%s262_s27 + $0x1] sm:$0x1] %vm774_vm4, %v786_v40 }
 0x1a3 PF: > { %s17_s21 = sadd.s32 1, %s1050_s21  }
 0x1a4   : > { %p14_p4 = scmp.ge.s32.totalorder %s17_s21, 4  }
 0x1a6   :  { %16 = sbr.rel (!%p14_p4) target bundleno = 1 (0x1), region = 117 }

// kernel: discriminator_forward.4
= control target key start
LH: loop header
LB: loop body
LE: loop exit
PB: predicated region body
PF: predicated region fallthrough
CT: control target
= control target key end

     0   :  { %s1325_s21 = smov 0   ;;  %s1662_s0 = inlined_call_operand.vmem [shape: f32[2,16,16,3], index: 0, kind: input, shape index: {}]   ;;  %s1663_s1 = inlined_call_operand.vmem [shape: f32[27,32], index: 1, kind: input, shape index: {}]   ;;  %s1664_s2 = inlined_call_operand.vmem [shape: f32[1,32], index: 2, kind: input, shape index: {}]   ;;  %s1665_s3 = inlined_call_operand.vmem [shape: f32[1,3], index: 3, kind: input, shape index: {}, may-alias: {3,4}]   ;;  %s1666_s4 = inlined_call_operand.vmem [shape: f32[1,3], index: 4, kind: input, shape index: {}, may-alias: {3,4}]   ;;  %s1667_s5 = inlined_call_operand.vmem [shape: f32[2,64,32], index: 5, kind: output, shape index: {0}]   ;;  %s1668_s6 = inlined_call_operand.vmem [shape: f32[2,2,32], index: 6, kind: output, shape index: {1}]  }
   0x1 LB: > { %s1192_s3 = sadd.s32 4294967295, %s1279_s21   ;;  %p1196_p0 = scmp.ge.s32.totalorder %s1279_s21, 1  ;;  %s1279_s21 = sphi %s1325_s21, %s17_s21  }
   0x2   : > { %p215_p1 = scmp.lt.s32.totalorder %s1279_s21, 3 }
   0x4   : > { %p216_p2 = pnand %p1196_p0, %p215_p1 }
   0x5   : > { %p249_p3 = scmp.lt.s32.totalorder (!%p216_p2), %s1192_s3, 1  ;;  %s1282_s25 = smov (!%p216_p2), 6  }
   0x6   : > { %219 = sbr.rel (%p216_p2) target bundleno = 500 (0x1f4), region = 40  ;;  %s1283_s26 = smov (!%p216_p2), 3  }
   0x7   : > { %s1284_s27 = smov (!%p216_p2), 9   ;;  %s1285_s28 = smov (!%p216_p2), 12  }
   0x8   : > { %s1286_s29 = smov (!%p216_p2), 15   ;;  %s1287_s30 = smov (!%p216_p2), 18  }
   0x9   : > { %s1288_s11 = smov (!%p216_p2), 21   ;;  %s1289_s16 = smov (!%p216_p2), 24  }
   0xb   : > { %vm295_vm0 = vcmask 23552   ;;  %vm298_vm1 = vcmask 17408   ;;  %v1281_v0 = vmov 0.0   ;;  %s1670_s3 = smov (!%p249_p3, %s1192_s3), 1  ;;  %v856_v51 = vld [vmem:[%s1663_s1 + $0x18] sm:$0x7] }
   0xc   : > { %296 = vst.msk [vmem:[#allocation2] sm:$0xff] %vm295_vm0, %v1281_v0  ;;  %297 = vst.msk [vmem:[#allocation2 + $0x8] sm:$0xff] %vm295_vm0, %v1281_v0  ;;  %s1214_s4 = sshll.u32 %s1670_s3, 8  ;;  %vm889_vm2 = vcmask 1042432   ;;  %v855_v52 = vld [vmem:[%s1663_s1 + $0x10] sm:$0xff]  ;;  %v854_v53 = vld [vmem:[%s1663_s1 + $0x8] sm:$0xff] }
   0xd   : > { %299 = vst.msk [vmem:[#allocation2 + $0x10] sm:$0x3] %vm298_vm1, %v1281_v0  ;;  %302 = vst.msk [vmem:[#allocation2 + $0x28] sm:$0x3] %vm298_vm1, %v1281_v0  ;;  %s1394_s24 = scalar_lea.vmem %s1662_s0, %s1214_s4  ;;  %1228 = vmatprep.subr.msk.mxu0 %vm889_vm2, %v856_v51  ;;  %1248 = vmatprep.subr.msk.mxu1 %vm889_vm2, %v856_v51  ;;  %v853_v56 = vld [vmem:[%s1663_s1] sm:$0xff]  ;;  %vm790_vm3 = vcmask 48128  }
   0xe   : > { %300 = vst.msk [vmem:[#allocation2 + $0x18] sm:$0xff] %vm295_vm0, %v1281_v0  ;;  %301 = vst.msk [vmem:[#allocation2 + $0x20] sm:$0xff] %vm295_vm0, %v1281_v0  ;;  %v265_v1 = vld [vmem:[%s1394_s24 + $0x10] sm:$0xff]  ;;  %v266_v2 = vld [vmem:[%s1394_s24 + $0x18] sm:$0xff]  ;;  %1229 = vmatpush3.msk.msra.mxu0 %vm889_vm2, %v856_v51  ;;  %1252 = vmatpush3.msk.msra.mxu1 %vm889_vm2, %v856_v51  ;;  %vm799_vm4 = vcmask 72704   ;;  %vm808_vm5 = vcmask 97280  }
   0xf   : > { %303 = vst.msk [vmem:[#allocation2 + $0x30] sm:$0xff] %vm295_vm0, %v1281_v0  ;;  %304 = vst.msk [vmem:[#allocation2 + $0x38] sm:$0xff] %vm295_vm0, %v1281_v0  ;;  %v267_v3 = vld [vmem:[%s1394_s24 + $0x20] sm:$0xff]  ;;  %v268_v6 = vld [vmem:[%s1394_s24 + $0x28] sm:$0xff]  ;;  %1230 = vmatprep.subr.mxu0 %v855_v52  ;;  %1249 = vmatprep.subr.mxu1 %v855_v52  ;;  %vm817_vm6 = vcmask 121856   ;;  %vm826_vm7 = vcmask 146432  }
  0x10   : > { %305 = vst.msk [vmem:[#allocation2 + $0x40] sm:$0x3] %vm298_vm1, %v1281_v0  ;;  %308 = vst.msk [vmem:[#allocation2 + $0x58] sm:$0x3] %vm298_vm1, %v1281_v0  ;;  %v263_v7 = vld [vmem:[%s1394_s24] sm:$0xff]  ;;  %v264_v8 = vld [vmem:[%s1394_s24 + $0x8] sm:$0xff]  ;;  %1231 = vmatpush3.msra.mxu0 %v855_v52  ;;  %1253 = vmatpush3.msra.mxu1 %v855_v52 }
  0x11   : > { %306 = vst.msk [vmem:[#allocation2 + $0x48] sm:$0xff] %vm295_vm0, %v1281_v0  ;;  %307 = vst.msk [vmem:[#allocation2 + $0x50] sm:$0xff] %vm295_vm0, %v1281_v0  ;;  %v269_v9 = vld [vmem:[%s1394_s24 + $0x30] sm:$0xff]  ;;  %v270_v10 = vld [vmem:[%s1394_s24 + $0x38] sm:$0xff]  ;;  %1232 = vmatprep.subr.mxu0 %v854_v53  ;;  %1250 = vmatprep.subr.mxu1 %v854_v53  ;;  %vm835_vm8 = vcmask 171008   ;;  %vm844_vm9 = vcmask 195584  }
  0x12   : > { %309 = vst.msk [vmem:[#allocation2 + $0x60] sm:$0xff] %vm295_vm0, %v1281_v0  ;;  %310 = vst.msk [vmem:[#allocation2 + $0x68] sm:$0xff] %vm295_vm0, %v1281_v0  ;;  %v273_v11 = vld [vmem:[%s1394_s24 + $0x50] sm:$0xff]  ;;  %v274_v12 = vld [vmem:[%s1394_s24 + $0x58] sm:$0xff]  ;;  %1233 = vmatpush3.msra.mxu0 %v854_v53  ;;  %1254 = vmatpush3.msra.mxu1 %v854_v53  ;;  %vm864_vm10 = vcmask 220160   ;;  %s1215_s17 = sshll.u32 %s1670_s3, 6 }
  0x13   : > { %311 = vst.msk [vmem:[#allocation2 + $0x70] sm:$0x3] %vm298_vm1, %v1281_v0  ;;  %314 = vst.msk [vmem:[#allocation2 + $0x88] sm:$0x3] %vm298_vm1, %v1281_v0  ;;  %v400_v5 = vld [vmem:[#allocation2 + $0x1] ss:$2 sm:$0xff]  ;;  %1234 = vmatprep.subr.mxu0 %v853_v56  ;;  %1251 = vmatprep.subr.mxu1 %v853_v56  ;;  %s1621_s22 = scalar_lea.vmem %s1667_s5, %s1215_s17 }
  0x14   : > { %312 = vst.msk [vmem:[#allocation2 + $0x78] sm:$0xff] %vm295_vm0, %v1281_v0  ;;  %313 = vst.msk [vmem:[#allocation2 + $0x80] sm:$0xff] %vm295_vm0, %v1281_v0  ;;  %v416_v4 = vld [vmem:[#allocation2 + $0x2] ss:$2 sm:$0xff]  ;;  %534 = vrot.lane.b32.xlu0 %v400_v5, %s1283_s26  ;;  %v278_v18 = vld [vmem:[%s1394_s24 + $0x78] sm:$0xff]  ;;  %1235 = vmatpush3.msra.mxu0 %v853_v56  ;;  %vm998_vm11 = vcmask 261120  }
  0x15   : > { %315 = vst.msk [vmem:[#allocation2 + $0x90] sm:$0xff] %vm295_vm0, %v1281_v0  ;;  %316 = vst.msk [vmem:[#allocation2 + $0x98] sm:$0xff] %vm295_vm0, %v1281_v0  ;;  %566 = vrot.lane.b32.xlu1 %v416_v4, %s1282_s25  ;;  %v271_v13 = vld [vmem:[%s1394_s24 + $0x40] sm:$0xff]  ;;  %v272_v14 = vld [vmem:[%s1394_s24 + $0x48] sm:$0xff]  ;;  %1255 = vmatpush3.msra.mxu1 %v853_v56  ;;  %s1201_s23 = sshll.u32 %s1670_s3, 1  ;;  %vm1028_vm12 = vcmask 253952  }
  0x16   : > { %317 = vst.msk [vmem:[#allocation2 + $0xa0] sm:$0x3] %vm298_vm1, %v1281_v0  ;;  %320 = vst.msk [vmem:[#allocation2 + $0xb8] sm:$0x3] %vm298_vm1, %v1281_v0  ;;  %v275_v15 = vld [vmem:[%s1394_s24 + $0x60] sm:$0xff]  ;;  %v276_v16 = vld [vmem:[%s1394_s24 + $0x68] sm:$0xff] }
  0x17   : > { %318 = vst.msk [vmem:[#allocation2 + $0xa8] sm:$0xff] %vm295_vm0, %v1281_v0  ;;  %319 = vst.msk [vmem:[#allocation2 + $0xb0] sm:$0xff] %vm295_vm0, %v1281_v0  ;;  %v277_v17 = vld [vmem:[%s1394_s24 + $0x70] sm:$0xff]  ;;  %v282_v20 = vld [vmem:[%s1394_s24 + $0x98] sm:$0xff] }
  0x18   : > { %321 = vst.msk [vmem:[#allocation2 + $0xc0] sm:$0xff] %vm295_vm0, %v1281_v0  ;;  %322 = vst.msk [vmem:[#allocation2 + $0xc8] sm:$0xff] %vm295_vm0, %v1281_v0  ;;  %v281_v19 = vld [vmem:[%s1394_s24 + $0x90] sm:$0xff]  ;;  %v279_v21 = vld [vmem:[%s1394_s24 + $0x80] sm:$0xff] }
  0x19   : > { %323 = vst.msk [vmem:[#allocation2 + $0xd0] sm:$0x3] %vm298_vm1, %v1281_v0  ;;  %326 = vst.msk [vmem:[#allocation2 + $0xe8] sm:$0x3] %vm298_vm1, %v1281_v0  ;;  %v280_v22 = vld [vmem:[%s1394_s24 + $0x88] sm:$0xff]  ;;  %v283_v23 = vld [vmem:[%s1394_s24 + $0xa0] sm:$0xff] }
  0x1a   : > { %324 = vst.msk [vmem:[#allocation2 + $0xd8] sm:$0xff] %vm295_vm0, %v1281_v0  ;;  %325 = vst.msk [vmem:[#allocation2 + $0xe0] sm:$0xff] %vm295_vm0, %v1281_v0  ;;  %v284_v32 = vld [vmem:[%s1394_s24 + $0xa8] sm:$0xff]  ;;  %v285_v33 = vld [vmem:[%s1394_s24 + $0xb0] sm:$0xff] }
  0x1b   : > { %327 = vst.msk [vmem:[#allocation2 + $0xf0] sm:$0xff] %vm295_vm0, %v1281_v0  ;;  %328 = vst.msk [vmem:[#allocation2 + $0xf8] sm:$0xff] %vm295_vm0, %v1281_v0  ;;  %v286_v34 = vld [vmem:[%s1394_s24 + $0xb8] sm:$0xff]  ;;  %v289_v36 = vld [vmem:[%s1394_s24 + $0xd0] sm:$0xff] }
  0x1c   : > { %329 = vst.msk [vmem:[#allocation2 + $0x100] sm:$0x3] %vm298_vm1, %v1281_v0  ;;  %332 = vst.msk [vmem:[#allocation2 + $0x118] sm:$0x3] %vm298_vm1, %v1281_v0  ;;  %v290_v37 = vld [vmem:[%s1394_s24 + $0xd8] sm:$0xff]  ;;  %v287_v39 = vld [vmem:[%s1394_s24 + $0xc0] sm:$0xff] }
  0x1d   : > { %330 = vst.msk [vmem:[#allocation2 + $0x108] sm:$0xff] %vm295_vm0, %v1281_v0  ;;  %331 = vst.msk [vmem:[#allocation2 + $0x110] sm:$0xff] %vm295_vm0, %v1281_v0  ;;  %v288_v40 = vld [vmem:[%s1394_s24 + $0xc8] sm:$0xff]  ;;  %v291_v41 = vld [vmem:[%s1394_s24 + $0xe0] sm:$0xff] }
  0x1e   : > { %333 = vst.msk [vmem:[#allocation2 + $0x120] sm:$0xff] %vm295_vm0, %v1281_v0  ;;  %334 = vst.msk [vmem:[#allocation2 + $0x128] sm:$0xff] %vm295_vm0, %v1281_v0  ;;  %v292_v42 = vld [vmem:[%s1394_s24 + $0xe8] sm:$0xff]  ;;  %v293_v43 = vld [vmem:[%s1394_s24 + $0xf0] sm:$0xff] }
  0x1f   : > { %335 = vst.msk [vmem:[#allocation2 + $0x130] sm:$0x3] %vm298_vm1, %v1281_v0  ;;  %338 = vst.msk [vmem:[#allocation2 + $0x148] sm:$0x3] %vm298_vm1, %v1281_v0  ;;  %v294_v44 = vld [vmem:[%s1394_s24 + $0xf8] sm:$0xff] }
  0x20   : > { %336 = vst.msk [vmem:[#allocation2 + $0x138] sm:$0xff] %vm295_vm0, %v1281_v0  ;;  %337 = vst.msk [vmem:[#allocation2 + $0x140] sm:$0xff] %vm295_vm0, %v1281_v0  ;;  %v384_v53 = vld [vmem:[#allocation2] ss:$2 sm:$0xff] }
  0x21   : > { %339 = vst.msk [vmem:[#allocation2 + $0x150] sm:$0xff] %vm295_vm0, %v1281_v0  ;;  %340 = vst.msk [vmem:[#allocation2 + $0x158] sm:$0xff] %vm295_vm0, %v1281_v0 }
  0x22   : > { %341 = vst.msk [vmem:[#allocation2 + $0x160] sm:$0x3] %vm298_vm1, %v1281_v0  ;;  %344 = vst.msk [vmem:[#allocation2 + $0x178] sm:$0x3] %vm298_vm1, %v1281_v0 }
  0x23   : > { %342 = vst.msk [vmem:[#allocation2 + $0x168] sm:$0xff] %vm295_vm0, %v1281_v0  ;;  %343 = vst.msk [vmem:[#allocation2 + $0x170] sm:$0xff] %vm295_vm0, %v1281_v0 }
  0x24   : > { %345 = vst.msk [vmem:[#allocation2 + $0x180] sm:$0xff] %vm295_vm0, %v1281_v0  ;;  %346 = vst.msk [vmem:[#allocation2 + $0x188] sm:$0xff] %vm295_vm0, %v1281_v0 }
  0x25   : > { %347 = vst.msk [vmem:[#allocation2 + $0x190] sm:$0x3] %vm298_vm1, %v1281_v0 }
  0x26   : > { %354 = vst.msk [vmem:[#allocation2 + $0x31] sm:$0xff] %vm295_vm0, %v265_v1  ;;  %355 = vst.msk [vmem:[#allocation2 + $0x39] sm:$0xff] %vm295_vm0, %v266_v2 }
  0x27   : > { %356 = vst.msk [vmem:[#allocation2 + $0x49] sm:$0xff] %vm295_vm0, %v267_v3  ;;  %357 = vst.msk [vmem:[#allocation2 + $0x51] sm:$0xff] %vm295_vm0, %v268_v6 }
  0x28   : > { %352 = vst.msk [vmem:[#allocation2 + $0x19] sm:$0xff] %vm295_vm0, %v263_v7  ;;  %353 = vst.msk [vmem:[#allocation2 + $0x21] sm:$0xff] %vm295_vm0, %v264_v8 }
  0x29   : > { %358 = vst.msk [vmem:[#allocation2 + $0x61] sm:$0xff] %vm295_vm0, %v269_v9  ;;  %359 = vst.msk [vmem:[#allocation2 + $0x69] sm:$0xff] %vm295_vm0, %v270_v10 }
  0x2a   : > { %362 = vst.msk [vmem:[#allocation2 + $0x91] sm:$0xff] %vm295_vm0, %v273_v11  ;;  %363 = vst.msk [vmem:[#allocation2 + $0x99] sm:$0xff] %vm295_vm0, %v274_v12 }
  0x2b   : > { %360 = vst.msk [vmem:[#allocation2 + $0x79] sm:$0xff] %vm295_vm0, %v271_v13  ;;  %361 = vst.msk [vmem:[#allocation2 + $0x81] sm:$0xff] %vm295_vm0, %v272_v14 }
  0x2c   : > { %364 = vst.msk [vmem:[#allocation2 + $0xa9] sm:$0xff] %vm295_vm0, %v275_v15  ;;  %365 = vst.msk [vmem:[#allocation2 + $0xb1] sm:$0xff] %vm295_vm0, %v276_v16 }
  0x2d   : > { %366 = vst.msk [vmem:[#allocation2 + $0xc1] sm:$0xff] %vm295_vm0, %v277_v17  ;;  %367 = vst.msk [vmem:[#allocation2 + $0xc9] sm:$0xff] %vm295_vm0, %v278_v18  ;;  %v418_v24 = vld [vmem:[#allocation2 + $0x32] ss:$2 sm:$0xff]  ;;  %v402_v25 = vld [vmem:[#allocation2 + $0x31] ss:$2 sm:$0xff] }
  0x2e   : > { %370 = vst.msk [vmem:[#allocation2 + $0xf1] sm:$0xff] %vm295_vm0, %v281_v19  ;;  %371 = vst.msk [vmem:[#allocation2 + $0xf9] sm:$0xff] %vm295_vm0, %v282_v20  ;;  %568 = vrot.lane.b32.xlu1 %v418_v24, %s1282_s25  ;;  %536 = vrot.lane.b32.xlu0 %v402_v25, %s1283_s26  ;;  %v433_v26 = vld [vmem:[#allocation2 + $0x48] ss:$2 sm:$0xff]  ;;  %v449_v31 = vld [vmem:[#allocation2 + $0x49] ss:$2 sm:$0xff] }
  0x2f   : > { %368 = vst.msk [vmem:[#allocation2 + $0xd9] sm:$0xff] %vm295_vm0, %v279_v21  ;;  %369 = vst.msk [vmem:[#allocation2 + $0xe1] sm:$0xff] %vm295_vm0, %v280_v22  ;;  %v431_v27 = vld [vmem:[#allocation2 + $0x18] ss:$2 sm:$0xff]  ;;  %v447_v29 = vld [vmem:[#allocation2 + $0x19] ss:$2 sm:$0xff] }
  0x30   : > { %372 = vst.msk [vmem:[#allocation2 + $0x109] sm:$0xff] %vm295_vm0, %v283_v23  ;;  %v404_v28 = vld [vmem:[#allocation2 + $0x61] ss:$2 sm:$0xff]  ;;  %v463_v30 = vld [vmem:[#allocation2 + $0x1a] ss:$2 sm:$0xff]  ;;  %373 = vst.msk [vmem:[#allocation2 + $0x111] sm:$0xff] %vm295_vm0, %v284_v32 }
  0x31   : > { %v420_v35 = vld [vmem:[#allocation2 + $0x62] ss:$2 sm:$0xff]  ;;  %374 = vst.msk [vmem:[#allocation2 + $0x121] sm:$0xff] %vm295_vm0, %v285_v33  ;;  %375 = vst.msk [vmem:[#allocation2 + $0x129] sm:$0xff] %vm295_vm0, %v286_v34  ;;  %v406_v38 = vld [vmem:[#allocation2 + $0x91] ss:$2 sm:$0xff] }
  0x32   : > { %600 = vrot.lane.b32.xlu1 %v433_v26, %s1284_s27  ;;  %598 = vrot.lane.b32.xlu0 %v431_v27, %s1284_s27  ;;  %378 = vst.msk [vmem:[#allocation2 + $0x151] sm:$0xff] %vm295_vm0, %v289_v36  ;;  %379 = vst.msk [vmem:[#allocation2 + $0x159] sm:$0xff] %vm295_vm0, %v290_v37  ;;  %v479_v45 = vld [vmem:[#allocation2 + $0x30] ss:$2 sm:$0xff]  ;;  %v495_v49 = vld [vmem:[#allocation2 + $0x31] ss:$2 sm:$0xff] }
  0x33   : > { %376 = vst.msk [vmem:[#allocation2 + $0x139] sm:$0xff] %vm295_vm0, %v287_v39  ;;  %377 = vst.msk [vmem:[#allocation2 + $0x141] sm:$0xff] %vm295_vm0, %v288_v40  ;;  %v465_v46 = vld [vmem:[#allocation2 + $0x4a] ss:$2 sm:$0xff]  ;;  %v451_v54 = vld [vmem:[#allocation2 + $0x79] ss:$2 sm:$0xff] }
  0x34   : > { %380 = vst.msk [vmem:[#allocation2 + $0x169] sm:$0xff] %vm295_vm0, %v291_v41  ;;  %381 = vst.msk [vmem:[#allocation2 + $0x171] sm:$0xff] %vm295_vm0, %v292_v42  ;;  %v435_v47 = vld [vmem:[#allocation2 + $0x78] ss:$2 sm:$0xff]  ;;  %v437_v55 = vld [vmem:[#allocation2 + $0xa8] ss:$2 sm:$0xff] }
  0x35   : > { %382 = vst.msk [vmem:[#allocation2 + $0x181] sm:$0xff] %vm295_vm0, %v293_v43  ;;  %383 = vst.msk [vmem:[#allocation2 + $0x189] sm:$0xff] %vm295_vm0, %v294_v44  ;;  %v422_v48 = vld [vmem:[#allocation2 + $0x92] ss:$2 sm:$0xff]  ;;  %v497_v58 = vld [vmem:[#allocation2 + $0x61] ss:$2 sm:$0xff] }
  0x36   : > { %538 = vrot.lane.b32.xlu1 %v404_v28, %s1283_s26  ;;  %630 = vrot.lane.b32.xlu0 %v447_v29, %s1285_s28  ;;  %v481_v50 = vld [vmem:[#allocation2 + $0x60] ss:$2 sm:$0xff]  ;;  %v453_v59 = vld [vmem:[#allocation2 + $0xa9] ss:$2 sm:$0xff]  ;;  %v483_v1 = vld [vmem:[#allocation2 + $0x90] ss:$2 sm:$0xff] }
  0x37   : > { %v511_v57 = vld [vmem:[#allocation2 + $0x32] ss:$2 sm:$0xff]  ;;  %v408_v60 = vld [vmem:[#allocation2 + $0xc1] ss:$2 sm:$0xff]  ;;  %v513_v61 = vld [vmem:[#allocation2 + $0x62] ss:$2 sm:$0xff] }
  0x38   : > { %v467_v62 = vld [vmem:[#allocation2 + $0x7a] ss:$2 sm:$0xff]  ;;  %v410_v0 = vld [vmem:[#allocation2 + $0xf1] ss:$2 sm:$0xff]  ;;  %v469_v2 = vld [vmem:[#allocation2 + $0xaa] ss:$2 sm:$0xff] }
  0x39   : > { %v424_v63 = vld [vmem:[#allocation2 + $0xc2] ss:$2 sm:$0xff]  ;;  %v426_v4 = vld [vmem:[#allocation2 + $0xf2] ss:$2 sm:$0xff]  ;;  %v499_v5 = vld [vmem:[#allocation2 + $0x91] ss:$2 sm:$0xff] }
  0x3a   : > { %662 = vrot.lane.b32.xlu1 %v463_v30, %s1286_s29  ;;  %632 = vrot.lane.b32.xlu0 %v449_v31, %s1285_s28  ;;  %v439_v3 = vld [vmem:[#allocation2 + $0xd8] ss:$2 sm:$0xff]  ;;  %v455_v7 = vld [vmem:[#allocation2 + $0xd9] ss:$2 sm:$0xff]  ;;  %v441_v8 = vld [vmem:[#allocation2 + $0x108] ss:$2 sm:$0xff] }
  0x3b   : > { %v485_v6 = vld [vmem:[#allocation2 + $0xc0] ss:$2 sm:$0xff]  ;;  %v501_v10 = vld [vmem:[#allocation2 + $0xc1] ss:$2 sm:$0xff]  ;;  %v414_v16 = vld [vmem:[#allocation2 + $0x151] ss:$2 sm:$0xff] }
  0x3c   : > { %v515_v9 = vld [vmem:[#allocation2 + $0x92] ss:$2 sm:$0xff]  ;;  %v457_v11 = vld [vmem:[#allocation2 + $0x109] ss:$2 sm:$0xff]  ;;  %v517_v13 = vld [vmem:[#allocation2 + $0xc2] ss:$2 sm:$0xff] }
  0x3d   : > { %v412_v12 = vld [vmem:[#allocation2 + $0x121] ss:$2 sm:$0xff]  ;;  %v471_v14 = vld [vmem:[#allocation2 + $0xda] ss:$2 sm:$0xff]  ;;  %v473_v18 = vld [vmem:[#allocation2 + $0x10a] ss:$2 sm:$0xff] }
  0x3e   : > { %570 = vrot.lane.b32.xlu1 %v420_v35, %s1282_s25  ;;  %540 = vrot.lane.b32.xlu0 %v406_v38, %s1283_s26  ;;  %v428_v15 = vld [vmem:[#allocation2 + $0x122] ss:$2 sm:$0xff]  ;;  %v430_v20 = vld [vmem:[#allocation2 + $0x152] ss:$2 sm:$0xff]  ;;  %v503_v21 = vld [vmem:[#allocation2 + $0xf1] ss:$2 sm:$0xff] }
  0x3f   : > { %v487_v17 = vld [vmem:[#allocation2 + $0xf0] ss:$2 sm:$0xff]  ;;  %v489_v22 = vld [vmem:[#allocation2 + $0x120] ss:$2 sm:$0xff]  ;;  %v459_v23 = vld [vmem:[#allocation2 + $0x139] ss:$2 sm:$0xff] }
  0x40   : > { %v443_v19 = vld [vmem:[#allocation2 + $0x138] ss:$2 sm:$0xff]  ;;  %v445_v24 = vld [vmem:[#allocation2 + $0x168] ss:$2 sm:$0xff]  ;;  %v505_v26 = vld [vmem:[#allocation2 + $0x121] ss:$2 sm:$0xff] }
  0x41   : > { %v519_v25 = vld [vmem:[#allocation2 + $0xf2] ss:$2 sm:$0xff]  ;;  %v461_v28 = vld [vmem:[#allocation2 + $0x169] ss:$2 sm:$0xff]  ;;  %v521_v30 = vld [vmem:[#allocation2 + $0x122] ss:$2 sm:$0xff] }
  0x42   : > { %694 = vrot.lane.b32.xlu1 %v479_v45, %s1287_s30  ;;  %664 = vrot.lane.b32.xlu0 %v465_v46, %s1286_s29  ;;  %v475_v27 = vld [vmem:[#allocation2 + $0x13a] ss:$2 sm:$0xff]  ;;  %v477_v29 = vld [vmem:[#allocation2 + $0x16a] ss:$2 sm:$0xff]  ;;  %v509_v35 = vld [vmem:[#allocation2 + $0x181] ss:$2 sm:$0xff] }
  0x43   : > { %v493_v33 = vld [vmem:[#allocation2 + $0x180] ss:$2 sm:$0xff]  ;;  %v491_v34 = vld [vmem:[#allocation2 + $0x150] ss:$2 sm:$0xff]  ;;  %v507_v36 = vld [vmem:[#allocation2 + $0x151] ss:$2 sm:$0xff] }
  0x44   : > { %v525_v39 = vld [vmem:[#allocation2 + $0x182] ss:$2 sm:$0xff]  ;;  %v523_v40 = vld [vmem:[#allocation2 + $0x152] ss:$2 sm:$0xff] }
  0x46   : > { %602 = vrot.lane.b32.xlu1 %v435_v47, %s1284_s27  ;;  %572 = vrot.lane.b32.xlu0 %v422_v48, %s1282_s25 }
  0x4a   : > { %726 = vrot.lane.b32.xlu1 %v495_v49, %s1288_s11  ;;  %696 = vrot.lane.b32.xlu0 %v481_v50, %s1287_s30 }
  0x4e   : > { %634 = vrot.lane.b32.xlu1 %v451_v54, %s1285_s28  ;;  %604 = vrot.lane.b32.xlu0 %v437_v55, %s1284_s27 }
  0x52   : > { %758 = vrot.lane.b32.xlu1 %v511_v57, %s1289_s16  ;;  %728 = vrot.lane.b32.xlu0 %v497_v58, %s1288_s11 }
  0x56   : > { %636 = vrot.lane.b32.xlu1 %v453_v59, %s1285_s28  ;;  %542 = vrot.lane.b32.xlu0 %v408_v60, %s1283_s26 }
  0x5a   : > { %760 = vrot.lane.b32.xlu1 %v513_v61, %s1289_s16  ;;  %666 = vrot.lane.b32.xlu0 %v467_v62, %s1286_s29  ;;  %v386_v61 = vld [vmem:[#allocation2 + $0x30] ss:$2 sm:$0xff] }
  0x5e   : > { %574 = vrot.lane.b32.xlu1 %v424_v63, %s1282_s25  ;;  %544 = vrot.lane.b32.xlu0 %v410_v0, %s1283_s26 }
  0x62   : > { %698 = vrot.lane.b32.xlu1 %v483_v1, %s1287_s30  ;;  %668 = vrot.lane.b32.xlu0 %v469_v2, %s1286_s29 }
  0x66   : > { %606 = vrot.lane.b32.xlu1 %v439_v3, %s1284_s27  ;;  %576 = vrot.lane.b32.xlu0 %v426_v4, %s1282_s25 }
  0x6a   : > { %730 = vrot.lane.b32.xlu1 %v499_v5, %s1288_s11  ;;  %700 = vrot.lane.b32.xlu0 %v485_v6, %s1287_s30 }
  0x6e   : > { %638 = vrot.lane.b32.xlu1 %v455_v7, %s1285_s28  ;;  %608 = vrot.lane.b32.xlu0 %v441_v8, %s1284_s27 }
  0x72   : > { %762 = vrot.lane.b32.xlu1 %v515_v9, %s1289_s16  ;;  %732 = vrot.lane.b32.xlu0 %v501_v10, %s1288_s11 }
  0x76   : > { %640 = vrot.lane.b32.xlu1 %v457_v11, %s1285_s28  ;;  %546 = vrot.lane.b32.xlu0 %v412_v12, %s1283_s26 }
  0x7a   : > { %764 = vrot.lane.b32.xlu1 %v517_v13, %s1289_s16  ;;  %670 = vrot.lane.b32.xlu0 %v471_v14, %s1286_s29 }
  0x7e   : > { %578 = vrot.lane.b32.xlu1 %v428_v15, %s1282_s25  ;;  %548 = vrot.lane.b32.xlu0 %v414_v16, %s1283_s26  ;;  %s262_s26 = scalar_lea.vmem %s1668_s6, %s1201_s23 }
  0x82   : > { %702 = vrot.lane.b32.xlu1 %v487_v17, %s1287_s30  ;;  %672 = vrot.lane.b32.xlu0 %v473_v18, %s1286_s29 }
  0x86   : > { %610 = vrot.lane.b32.xlu1 %v443_v19, %s1284_s27  ;;  %580 = vrot.lane.b32.xlu0 %v430_v20, %s1282_s25  ;;  %v535_v32 = vpop.permute.xlu0 %534 }
  0x87   : > { %v567_v31 = vpop.permute.xlu1 %566  ;;  %v782_v54 = vsel %vm295_vm0, %v384_v53, %v535_v32 }
  0x88   : > { %v791_v57 = vsel %vm790_vm3, %v782_v54, %v567_v31 }
  0x8a   : > { %734 = vrot.lane.b32.xlu1 %v503_v21, %s1288_s11  ;;  %704 = vrot.lane.b32.xlu0 %v489_v22, %s1287_s30 }
  0x8e   : > { %642 = vrot.lane.b32.xlu1 %v459_v23, %s1285_s28  ;;  %612 = vrot.lane.b32.xlu0 %v445_v24, %s1284_s27  ;;  %v388_v23 = vld [vmem:[#allocation2 + $0x60] ss:$2 sm:$0xff] }
  0x92   : > { %766 = vrot.lane.b32.xlu1 %v519_v25, %s1289_s16  ;;  %736 = vrot.lane.b32.xlu0 %v505_v26, %s1288_s11 }
  0x96   : > { %674 = vrot.lane.b32.xlu1 %v475_v27, %s1286_s29  ;;  %644 = vrot.lane.b32.xlu0 %v461_v28, %s1285_s28 }
  0x9a   : > { %676 = vrot.lane.b32.xlu1 %v477_v29, %s1286_s29  ;;  %768 = vrot.lane.b32.xlu0 %v521_v30, %s1289_s16 }
  0x9e   : > { %708 = vrot.lane.b32.xlu1 %v493_v33, %s1287_s30  ;;  %706 = vrot.lane.b32.xlu0 %v491_v34, %s1287_s30  ;;  %v390_v33 = vld [vmem:[#allocation2 + $0x90] ss:$2 sm:$0xff] }
  0xa0   : > { %v569_v37 = vpop.permute.xlu1 %568  ;;  %v537_v38 = vpop.permute.xlu0 %536 }
  0xa1   : > { %v783_v1 = vsel %vm295_vm0, %v386_v61, %v537_v38 }
  0xa2   : > { %740 = vrot.lane.b32.xlu1 %v509_v35, %s1288_s11  ;;  %738 = vrot.lane.b32.xlu0 %v507_v36, %s1288_s11  ;;  %v792_v6 = vsel %vm790_vm3, %v783_v1, %v569_v37 }
  0xa4   : > { %v601_v41 = vpop.permute.xlu1 %600  ;;  %v599_v42 = vpop.permute.xlu0 %598 }
  0xa5   : > { %v800_v58 = vsel %vm799_vm4, %v791_v57, %v599_v42  ;;  %v801_v7 = vsel %vm799_vm4, %v792_v6, %v601_v41  ;;  %v392_v57 = vld [vmem:[#allocation2 + $0xc0] ss:$2 sm:$0xff] }
  0xa6   : > { %772 = vrot.lane.b32.xlu1 %v525_v39, %s1289_s16  ;;  %770 = vrot.lane.b32.xlu0 %v523_v40, %s1289_s16 }
  0xa8   : > { %v539_v43 = vpop.permute.xlu1 %538  ;;  %v631_v44 = vpop.permute.xlu0 %630 }
  0xa9   : > { %v809_v62 = vsel %vm808_vm5, %v800_v58, %v631_v44  ;;  %v784_v26 = vsel %vm295_vm0, %v388_v23, %v539_v43 }
  0xac   : > { %v663_v45 = vpop.permute.xlu1 %662  ;;  %v633_v46 = vpop.permute.xlu0 %632 }
  0xad   : > { %v818_v63 = vsel %vm817_vm6, %v809_v62, %v663_v45  ;;  %v810_v10 = vsel %vm808_vm5, %v801_v7, %v633_v46 }
  0xb0   : > { %v571_v47 = vpop.permute.xlu1 %570  ;;  %v1536_v48 = vpop.permute.xlu0 %540 }
  0xb1   : > { %v793_v27 = vsel %vm790_vm3, %v784_v26, %v571_v47  ;;  %v785_v39 = vsel %vm295_vm0, %v390_v33, %v1536_v48 }
  0xb4   : > { %v695_v49 = vpop.permute.xlu1 %694  ;;  %v665_v50 = vpop.permute.xlu0 %664 }
  0xb5   : > { %v827_v0 = vsel %vm826_vm7, %v818_v63, %v695_v49  ;;  %v819_v11 = vsel %vm817_vm6, %v810_v10, %v665_v50 }
  0xb8   : > { %v603_v51 = vpop.permute.xlu1 %602  ;;  %v1538_v52 = vpop.permute.xlu0 %572 }
  0xb9   : > { %v802_v28 = vsel %vm799_vm4, %v793_v27, %v603_v51  ;;  %v794_v40 = vsel %vm790_vm3, %v785_v39, %v1538_v52 }
  0xbc   : > { %v727_v55 = vpop.permute.xlu1 %726  ;;  %v697_v56 = vpop.permute.xlu0 %696 }
  0xbd   : > { %v836_v2 = vsel %vm835_vm8, %v827_v0, %v727_v55  ;;  %v828_v12 = vsel %vm826_vm7, %v819_v11, %v697_v56 }
  0xc0   : > { %v635_v59 = vpop.permute.xlu1 %634  ;;  %v605_v60 = vpop.permute.xlu0 %604 }
  0xc1   : > { %v811_v31 = vsel %vm808_vm5, %v802_v28, %v635_v59  ;;  %v803_v41 = vsel %vm799_vm4, %v794_v40, %v605_v60 }
  0xc4   : > { %v759_v3 = vpop.permute.xlu1 %758  ;;  %v729_v4 = vpop.permute.xlu0 %728 }
  0xc5   : > { %v845_v5 = vsel %vm844_vm9, %v836_v2, %v759_v3  ;;  %v837_v13 = vsel %vm835_vm8, %v828_v12, %v729_v4  ;;  %v394_v3 = vld [vmem:[#allocation2 + $0xf0] ss:$2 sm:$0xff] }
  0xc6   : > { %1236 = vmatprep.mubr.msk.f32.mxu0 %vm864_vm10, %v845_v5 }
  0xc8   : > { %v637_v8 = vpop.permute.xlu1 %636  ;;  %v543_v9 = vpop.permute.xlu0 %542 }
  0xc9   : > { %v812_v44 = vsel %vm808_vm5, %v803_v41, %v637_v8  ;;  %v786_v60 = vsel %vm295_vm0, %v392_v57, %v543_v9 }
  0xcc   : > { %v761_v14 = vpop.permute.xlu1 %760  ;;  %v667_v15 = vpop.permute.xlu0 %666 }
  0xcd   : > { %v846_v16 = vsel %vm844_vm9, %v837_v13, %v761_v14  ;;  %v820_v32 = vsel %vm817_vm6, %v811_v31, %v667_v15 }
  0xce   : > { %1237 = vmatmul.mubr.msk.f32.vlgmr.msra.gmra.mxu0 %vm864_vm10, %v846_v16 }
  0xd0   : > { %v575_v17 = vpop.permute.xlu1 %574  ;;  %v545_v18 = vpop.permute.xlu0 %544 }
  0xd1   : > { %v795_v61 = vsel %vm790_vm3, %v786_v60, %v575_v17  ;;  %v787_v9 = vsel %vm295_vm0, %v394_v3, %v545_v18 }
  0xd4   : > { %v699_v19 = vpop.permute.xlu1 %698  ;;  %v669_v20 = vpop.permute.xlu0 %668 }
  0xd5   : > { %v829_v34 = vsel %vm826_vm7, %v820_v32, %v699_v19  ;;  %v821_v45 = vsel %vm817_vm6, %v812_v44, %v669_v20 }
  0xd8   : > { %v607_v21 = vpop.permute.xlu1 %606  ;;  %v577_v22 = vpop.permute.xlu0 %576 }
  0xd9   : > { %v804_v62 = vsel %vm799_vm4, %v795_v61, %v607_v21  ;;  %v796_v10 = vsel %vm790_vm3, %v787_v9, %v577_v22  ;;  %v396_v21 = vld [vmem:[#allocation2 + $0x120] ss:$2 sm:$0xff]  ;;  %v398_v22 = vld [vmem:[#allocation2 + $0x150] ss:$2 sm:$0xff] }
  0xdc   : > { %v731_v24 = vpop.permute.xlu1 %730  ;;  %v701_v25 = vpop.permute.xlu0 %700 }
  0xdd   : > { %v838_v35 = vsel %vm835_vm8, %v829_v34, %v731_v24  ;;  %v830_v46 = vsel %vm826_vm7, %v821_v45, %v701_v25  ;;  %v1202_v45 = vld [vmem:[%s1664_s2] ss:$0 sm:$0xff] }
  0xe0   : > { %v639_v29 = vpop.permute.xlu1 %638  ;;  %v609_v30 = vpop.permute.xlu0 %608 }
  0xe1   : > { %v813_v1 = vsel %vm808_vm5, %v804_v62, %v639_v29  ;;  %v805_v11 = vsel %vm799_vm4, %v796_v10, %v609_v30 }
  0xe4   : > { %v763_v36 = vpop.permute.xlu1 %762  ;;  %v733_v37 = vpop.permute.xlu0 %732 }
  0xe5   : > { %v847_v38 = vsel %vm844_vm9, %v838_v35, %v763_v36  ;;  %v839_v47 = vsel %vm835_vm8, %v830_v46, %v733_v37 }
  0xe6   : > { %1239 = vmatprep.mubr.msk.f32.mxu0 %vm864_vm10, %v847_v38 }
  0xe8   : > { %v641_v42 = vpop.permute.xlu1 %640  ;;  %v547_v43 = vpop.permute.xlu0 %546 }
  0xe9   : > { %v814_v14 = vsel %vm808_vm5, %v805_v11, %v641_v42  ;;  %v788_v25 = vsel %vm295_vm0, %v396_v21, %v547_v43 }
  0xec   : > { %v765_v49 = vpop.permute.xlu1 %764  ;;  %v671_v50 = vpop.permute.xlu0 %670 }
  0xed   : > { %v848_v48 = vsel %vm844_vm9, %v839_v47, %v765_v49  ;;  %v822_v2 = vsel %vm817_vm6, %v813_v1, %v671_v50 }
  0xee   : > { %1240 = vmatmul.mubr.msk.f32.gmra.mxu0 %vm864_vm10, %v848_v48 }
  0xf0   : > { %v579_v51 = vpop.permute.xlu1 %578  ;;  %v549_v52 = vpop.permute.xlu0 %548 }
  0xf1   : > { %v789_v26 = vsel %vm295_vm0, %v398_v22, %v549_v52  ;;  %v797_v27 = vsel %vm790_vm3, %v788_v25, %v579_v51 }
  0xf4   : > { %v703_v53 = vpop.permute.xlu1 %702  ;;  %v673_v54 = vpop.permute.xlu0 %672 }
  0xf5   : > { %v831_v4 = vsel %vm826_vm7, %v822_v2, %v703_v53  ;;  %v823_v15 = vsel %vm817_vm6, %v814_v14, %v673_v54 }
  0xf8   : > { %v611_v55 = vpop.permute.xlu1 %610  ;;  %v581_v56 = vpop.permute.xlu0 %580 }
  0xf9   : > { %v798_v28 = vsel %vm790_vm3, %v789_v26, %v581_v56  ;;  %v806_v29 = vsel %vm799_vm4, %v797_v27, %v611_v55 }
  0xfc   : > { %v735_v58 = vpop.permute.xlu1 %734  ;;  %v705_v59 = vpop.permute.xlu0 %704 }
  0xfd   : > { %v840_v5 = vsel %vm835_vm8, %v831_v4, %v735_v58  ;;  %v832_v16 = vsel %vm826_vm7, %v823_v15, %v705_v59 }
 0x100   : > { %v643_v63 = vpop.permute.xlu1 %642  ;;  %v613_v0 = vpop.permute.xlu0 %612 }
 0x101   : > { %v807_v30 = vsel %vm799_vm4, %v798_v28, %v613_v0  ;;  %v815_v33 = vsel %vm808_vm5, %v806_v29, %v643_v63 }
 0x104   : > { %v767_v6 = vpop.permute.xlu1 %766  ;;  %v737_v7 = vpop.permute.xlu0 %736 }
 0x105   : > { %v849_v8 = vsel %vm844_vm9, %v840_v5, %v767_v6  ;;  %v841_v17 = vsel %vm835_vm8, %v832_v16, %v737_v7 }
 0x106   : > { %1242 = vmatprep.mubr.msk.f32.mxu1 %vm864_vm10, %v849_v8 }
 0x108   : > { %v675_v12 = vpop.permute.xlu1 %674  ;;  %v645_v13 = vpop.permute.xlu0 %644 }
 0x109   : > { %v816_v34 = vsel %vm808_vm5, %v807_v30, %v645_v13  ;;  %v824_v35 = vsel %vm817_vm6, %v815_v33, %v675_v12 }
 0x10c   : > { %v677_v19 = vpop.permute.xlu1 %676  ;;  %v769_v20 = vpop.permute.xlu0 %768 }
 0x10d   : > { %v850_v18 = vsel %vm844_vm9, %v841_v17, %v769_v20  ;;  %v825_v36 = vsel %vm817_vm6, %v816_v34, %v677_v19 }
 0x10e   : > { %1243 = vmatmul.mubr.msk.f32.vlgmr.msra.gmra.mxu1 %vm864_vm10, %v850_v18 }
 0x110   : > { %v709_v23 = vpop.permute.xlu1 %708  ;;  %v707_v24 = vpop.permute.xlu0 %706 }
 0x111   : > { %v834_v37 = vsel %vm826_vm7, %v825_v36, %v709_v23  ;;  %v833_v38 = vsel %vm826_vm7, %v824_v35, %v707_v24 }
 0x114   : > { %v741_v31 = vpop.permute.xlu1 %740  ;;  %v739_v32 = vpop.permute.xlu0 %738 }
 0x115   : > { %v843_v39 = vsel %vm835_vm8, %v834_v37, %v741_v31  ;;  %v842_v40 = vsel %vm835_vm8, %v833_v38, %v739_v32 }
 0x118   : > { %v773_v41 = vpop.permute.xlu1 %772  ;;  %v771_v42 = vpop.permute.xlu0 %770 }
 0x119   : > { %v852_v43 = vsel %vm844_vm9, %v843_v39, %v773_v41  ;;  %v851_v44 = vsel %vm844_vm9, %v842_v40, %v771_v42 }
 0x11a   : > { %1245 = vmatprep.mubr.msk.f32.mxu1 %vm864_vm10, %v851_v44 }
 0x11b   : > { %1246 = vmatmul.mubr.msk.f32.gmra.mxu1 %vm864_vm10, %v852_v43 }
 0x18e   : > { %v1238_v46 = vpop.f32.mrf.mxu0 }
 0x18f   : > { %v965_v47 = vadd.f32 %v1238_v46, %v1202_v45 }
 0x190   : > { %v959_v49 = vpop.f32.mrf.mxu0 }
 0x191   : > { %1000 = vst.msk [vmem:[%s1621_s22 + $0x8] sm:$0xff] %vm998_vm11, %v965_v47  ;;  %v1031_v50 = vmul.f32 %v965_v47, %v965_v47  ;;  %v960_v48 = vadd.f32 %v1202_v45, %v959_v49  ;;  %v1008_v51 = vsel %vm998_vm11, %v965_v47, 0.0 }
 0x193   : > { %999 = vst.msk [vmem:[%s1621_s22] sm:$0xff] %vm998_vm11, %v960_v48  ;;  %v1007_v52 = vsel %vm998_vm11, %v960_v48, 0.0  ;;  %v1030_v53 = vmul.f32 %v960_v48, %v960_v48  ;;  %v1039_v55 = vsel %vm998_vm11, %v1031_v50, 0.0 }
 0x194   : > { %v1009_v54 = vadd.f32 %v1008_v51, %v1007_v52 }
 0x195   : > { %v1038_v56 = vsel %vm998_vm11, %v1030_v53, 0.0 }
 0x196   : > { %v1040_v57 = vadd.f32 %v1039_v55, %v1038_v56 }
 0x1ae   : > { %v1241_v58 = vpop.f32.mrf.mxu0 }
 0x1af   : > { %v975_v59 = vadd.f32 %v1241_v58, %v1202_v45 }
 0x1b0   : > { %v969_v60 = vpop.f32.mrf.mxu0 }
 0x1b1   : > { %1002 = vst.msk [vmem:[%s1621_s22 + $0x18] sm:$0xff] %vm998_vm11, %v975_v59  ;;  %v970_v61 = vadd.f32 %v1202_v45, %v969_v60  ;;  %v1033_v6 = vmul.f32 %v975_v59, %v975_v59  ;;  %v1012_v9 = vsel %vm998_vm11, %v975_v59, 0.0 }
 0x1b3   : > { %1001 = vst.msk [vmem:[%s1621_s22 + $0x10] sm:$0xff] %vm998_vm11, %v970_v61  ;;  %v1032_v0 = vmul.f32 %v970_v61, %v970_v61  ;;  %v1010_v3 = vsel %vm998_vm11, %v970_v61, 0.0  ;;  %v1043_v12 = vsel %vm998_vm11, %v1033_v6, 0.0 }
 0x1b4   : > { %v1011_v5 = vadd.f32 %v1010_v3, %v1009_v54 }
 0x1b5   : > { %v1041_v4 = vsel %vm998_vm11, %v1032_v0, 0.0 }
 0x1b6   : > { %v1042_v8 = vadd.f32 %v1041_v4, %v1040_v57  ;;  %v1013_v11 = vadd.f32 %v1012_v9, %v1011_v5 }
 0x1b8   : > { %v1044_v15 = vadd.f32 %v1043_v12, %v1042_v8 }
 0x1ce   : > { %v1244_v62 = vpop.f32.mrf.mxu1 }
 0x1cf   : > { %v985_v63 = vadd.f32 %v1244_v62, %v1202_v45 }
 0x1d0   : > { %v979_v1 = vpop.f32.mrf.mxu1 }
 0x1d1   : > { %1004 = vst.msk [vmem:[%s1621_s22 + $0x28] sm:$0xff] %vm998_vm11, %v985_v63  ;;  %v980_v2 = vadd.f32 %v1202_v45, %v979_v1  ;;  %v1035_v17 = vmul.f32 %v985_v63, %v985_v63  ;;  %v1016_v21 = vsel %vm998_vm11, %v985_v63, 0.0 }
 0x1d3   : > { %1003 = vst.msk [vmem:[%s1621_s22 + $0x20] sm:$0xff] %vm998_vm11, %v980_v2  ;;  %v1034_v7 = vmul.f32 %v980_v2, %v980_v2  ;;  %v1014_v10 = vsel %vm998_vm11, %v980_v2, 0.0  ;;  %v1047_v24 = vsel %vm998_vm11, %v1035_v17, 0.0 }
 0x1d4   : > { %v1015_v14 = vadd.f32 %v1014_v10, %v1013_v11 }
 0x1d5   : > { %v1045_v13 = vsel %vm998_vm11, %v1034_v7, 0.0 }
 0x1d6   : > { %v1046_v20 = vadd.f32 %v1045_v13, %v1044_v15  ;;  %v1017_v23 = vadd.f32 %v1016_v21, %v1015_v14 }
 0x1d8   : > { %v1048_v29 = vadd.f32 %v1047_v24, %v1046_v20 }
 0x1db   : > { %v1247_v16 = vpop.f32.mrf.mxu1 }
 0x1dc   : > { %v995_v19 = vadd.f32 %v1247_v16, %v1202_v45 }
 0x1dd   : > { %v989_v18 = vpop.f32.mrf.mxu1 }
 0x1de   : > { %1006 = vst.msk [vmem:[%s1621_s22 + $0x38] sm:$0xff] %vm998_vm11, %v995_v19  ;;  %v990_v22 = vadd.f32 %v1202_v45, %v989_v18  ;;  %v1037_v25 = vmul.f32 %v995_v19, %v995_v19  ;;  %v1020_v30 = vsel %vm998_vm11, %v995_v19, 0.0 }
 0x1e0   : > { %1005 = vst.msk [vmem:[%s1621_s22 + $0x30] sm:$0xff] %vm998_vm11, %v990_v22  ;;  %v1018_v26 = vsel %vm998_vm11, %v990_v22, 0.0  ;;  %v1036_v27 = vmul.f32 %v990_v22, %v990_v22  ;;  %v1051_v34 = vsel %vm998_vm11, %v1037_v25, 0.0 }
 0x1e1   : > { %v1019_v28 = vadd.f32 %v1018_v26, %v1017_v23 }
 0x1e2   : > { %v1049_v31 = vsel %vm998_vm11, %v1036_v27, 0.0 }
 0x1e3   : > { %v1021_v32 = vadd.f32 %v1020_v30, %v1019_v28  ;;  %v1050_v33 = vadd.f32 %v1049_v31, %v1048_v29 }
 0x1e5   : > { %v1022_v35 = vrot.slane %v1021_v32, 4  ;;  %v1052_v36 = vadd.f32 %v1051_v34, %v1050_v33 }
 0x1e7   : > { %v1023_v37 = vadd.f32 %v1022_v35, %v1021_v32  ;;  %v1053_v38 = vrot.slane %v1052_v36, 4 }
 0x1e9   : > { %v1024_v39 = vrot.slane %v1023_v37, 2  ;;  %v1054_v40 = vadd.f32 %v1053_v38, %v1052_v36 }
 0x1eb   : > { %v1025_v41 = vadd.f32 %v1024_v39, %v1023_v37  ;;  %v1055_v42 = vrot.slane %v1054_v40, 2 }
 0x1ed   : > { %v1026_v43 = vrot.slane %v1025_v41, 1  ;;  %v1056_v44 = vadd.f32 %v1055_v42, %v1054_v40 }
 0x1ef   : > { %v1027_v45 = vadd.f32 %v1026_v43, %v1025_v41  ;;  %v1057_v46 = vrot.slane %v1056_v44, 1 }
 0x1f1   : > { %1029 = vst.msk [vmem:[%s262_s26] sm:$0x1] %vm1028_vm12, %v1027_v45  ;;  %v1058_v47 = vadd.f32 %v1057_v46, %v1056_v44 }
 0x1f3   : > { %1059 = vst.msk [vmem:[%s262_s26 + $0x1] sm:$0x1] %vm1028_vm12, %v1058_v47 }
 0x1f4 PF: > { %s17_s21 = sadd.s32 1, %s1279_s21  }
 0x1f5   : > { %p14_p4 = scmp.ge.s32.totalorder %s17_s21, 4  }
 0x1f7   :  { %16 = sbr.rel (!%p14_p4) target bundleno = 1 (0x1), region = 153 }

// kernel: discriminator_forward.6
= control target key start
LH: loop header
LB: loop body
LE: loop exit
PB: predicated region body
PF: predicated region fallthrough
CT: control target
= control target key end

     0   :  { %s1076_s21 = smov 0   ;;  %s1376_s0 = inlined_call_operand.vmem [shape: f32[2,4,4,64], index: 0, kind: input, shape index: {}]   ;;  %s1377_s1 = inlined_call_operand.vmem [shape: f32[576,128], index: 1, kind: input, shape index: {}]   ;;  %s1378_s2 = inlined_call_operand.vmem [shape: f32[1,128], index: 2, kind: input, shape index: {}]   ;;  %s1379_s3 = inlined_call_operand.vmem [shape: f32[1,64], index: 3, kind: input, shape index: {}]   ;;  %s1380_s4 = inlined_call_operand.vmem [shape: f32[1,64], index: 4, kind: input, shape index: {}]   ;;  %s1381_s5 = inlined_call_operand.vmem [shape: f32[2,4,128], index: 5, kind: output, shape index: {0}]   ;;  %s1382_s6 = inlined_call_operand.vmem [shape: f32[2,2,128], index: 6, kind: output, shape index: {1}]  }
   0x1 LB: > { %s877_s22 = sadd.s32 4294967295, %s1035_s21   ;;  %p881_p0 = scmp.ge.s32.totalorder %s1035_s21, 1  ;;  %s1035_s21 = sphi %s1076_s21, %s17_s21  }
   0x2   : > { %p215_p1 = scmp.lt.s32.totalorder %s1035_s21, 3 }
   0x4   : > { %p216_p2 = pnand %p881_p0, %p215_p1 }
   0x5   : > { %p248_p3 = scmp.lt.s32.totalorder (!%p216_p2), %s877_s22, 1  ;;  %s1039_s27 = smov (!%p216_p2), 64  }
   0x6   : > { %219 = sbr.rel (%p216_p2) target bundleno = 420 (0x1a4), region = 40 }
   0xb   : > { %vm315_vm0 = vcmask 521216   ;;  %v504_v0 = vld [vmem:[%s1377_s1 + $0xf8] sm:$0xff]  ;;  %s1384_s22 = smov (!%p248_p3, %s877_s22), 1  ;;  %v1037_v1 = vmov 0.0   ;;  %v503_v3 = vld [vmem:[%s1377_s1 + $0xf0] sm:$0xff]  ;;  %v502_v6 = vld [vmem:[%s1377_s1 + $0xe8] sm:$0xff] }
   0xc   : > { %316 = vst.msk [vmem:[#allocation2] sm:$0x3f] %vm315_vm0, %v1037_v1  ;;  %317 = vst.msk [vmem:[#allocation2 + $0x8] sm:$0x3f] %vm315_vm0, %v1037_v1  ;;  %893 = vmatprep.subr.mxu0 %v504_v0  ;;  %v488_v2 = vld [vmem:[%s1377_s1 + $0x78] sm:$0xff]  ;;  %v487_v4 = vld [vmem:[%s1377_s1 + $0x70] sm:$0xff] }
   0xd   : > { %318 = vst.msk [vmem:[#allocation2 + $0x10] sm:$0x3f] %vm315_vm0, %v1037_v1  ;;  %319 = vst.msk [vmem:[#allocation2 + $0x18] sm:$0x3f] %vm315_vm0, %v1037_v1  ;;  %v886_v5 = vld [vmem:[%s1379_s3] ss:$0 sm:$0xff]  ;;  %894 = vmatpush3.msra.mxu0 %v488_v2 }
   0xe   : > { %320 = vst.msk [vmem:[#allocation2 + $0x20] sm:$0x3f] %vm315_vm0, %v1037_v1  ;;  %v536_v7 = vld [vmem:[%s1377_s1 + $0x1f8] sm:$0xff]  ;;  %s892_s13 = sshll.u32 %s1384_s22, 4  ;;  %v887_v8 = vld [vmem:[%s1380_s4] ss:$0 sm:$0xff]  ;;  %895 = vmatprep.subr.mxu0 %v503_v3 }
   0xf   : > { %v486_v9 = vld [vmem:[%s1377_s1 + $0x68] sm:$0xff]  ;;  %928 = vmatprep.subr.mxu1 %v536_v7  ;;  %v501_v10 = vld [vmem:[%s1377_s1 + $0xe0] sm:$0xff]  ;;  %v520_v11 = vld [vmem:[%s1377_s1 + $0x178] sm:$0xff]  ;;  %s252_s26 = scalar_lea.vmem %s1376_s0, %s892_s13  ;;  %896 = vmatpush3.msra.mxu0 %v487_v4  ;;  %vm323_vm1 = vcmask 519168   ;;  %vm468_vm2 = vcmask 523264   ;;  %vm1040_vm3 = vmmov 0  }
  0x10   : > { %929 = vmatpush3.msra.mxu1 %v520_v11  ;;  %v485_v12 = vld [vmem:[%s1377_s1 + $0x60] sm:$0xff]  ;;  %v535_v13 = vld [vmem:[%s1377_s1 + $0x1f0] sm:$0xff]  ;;  %v263_v17 = vld [vmem:[%s252_s26 + $0x8] sm:$0xf]  ;;  %897 = vmatprep.subr.mxu0 %v502_v6  ;;  %s884_s24 = sshll.u32 %s1384_s22, 2  ;;  %vm765_vm4 = vcmask 1043456  }
  0x11   : > { %v519_v14 = vld [vmem:[%s1377_s1 + $0x170] sm:$0xff]  ;;  %v261_v15 = vld [vmem:[%s252_s26] sm:$0xf]  ;;  %v262_v16 = vld [vmem:[%s252_s26 + $0x4] sm:$0xf]  ;;  %930 = vmatprep.subr.mxu1 %v535_v13  ;;  %v274_v20 = vmul.f32 %v886_v5, %v263_v17  ;;  %898 = vmatpush3.msra.mxu0 %v486_v9  ;;  %s885_s28 = sshll.u32 %s1384_s22, 1 }
  0x12   : > { %v272_v18 = vmul.f32 %v886_v5, %v261_v15  ;;  %v273_v19 = vmul.f32 %v886_v5, %v262_v16  ;;  %v264_v21 = vld [vmem:[%s252_s26 + $0xc] sm:$0xf]  ;;  %v500_v22 = vld [vmem:[%s1377_s1 + $0xd8] sm:$0xff]  ;;  %931 = vmatpush3.msra.mxu1 %v519_v14  ;;  %899 = vmatprep.subr.mxu0 %v501_v10  ;;  %v499_v30 = vld [vmem:[%s1377_s1 + $0xd0] sm:$0xff]  ;;  %s260_s7 = scalar_lea.vmem %s1382_s6, %s885_s28 }
  0x13   : > { %v534_v23 = vld [vmem:[%s1377_s1 + $0x1e8] sm:$0xff]  ;;  %v275_v24 = vmul.f32 %v886_v5, %v264_v21  ;;  %v484_v25 = vld [vmem:[%s1377_s1 + $0x58] sm:$0xff]  ;;  %v1153_v29 = vadd.f32 %v887_v8, %v274_v20  ;;  %900 = vmatpush3.msra.mxu0 %v485_v12  ;;  %v533_v31 = vld [vmem:[%s1377_s1 + $0x1e0] sm:$0xff] }
  0x14   : > { %932 = vmatprep.subr.mxu1 %v534_v23  ;;  %v518_v26 = vld [vmem:[%s1377_s1 + $0x168] sm:$0xff]  ;;  %v1149_v27 = vadd.f32 %v887_v8, %v272_v18  ;;  %v1151_v28 = vadd.f32 %v887_v8, %v273_v19  ;;  %901 = vmatprep.subr.mxu0 %v500_v22  ;;  %v483_v33 = vld [vmem:[%s1377_s1 + $0x50] sm:$0xff]  ;;  %v517_v34 = vld [vmem:[%s1377_s1 + $0x160] sm:$0xff] }
  0x15   : > { %933 = vmatpush3.msra.mxu1 %v518_v26  ;;  %v1161_v32 = vadd.f32 %v887_v8, %v275_v24  ;;  %v532_v35 = vld [vmem:[%s1377_s1 + $0x1d8] sm:$0xff]  ;;  %v289_v38 = vsub.f32 0.0, %v1153_v29  ;;  %902 = vmatpush3.msra.mxu0 %v484_v25  ;;  %v498_v39 = vld [vmem:[%s1377_s1 + $0xc8] sm:$0xff]  ;;  %v497_v43 = vld [vmem:[%s1377_s1 + $0xc0] sm:$0xff]  ;;  %v1038_v26 = vmov 1983009808  }
  0x16   : > { %934 = vmatprep.subr.mxu1 %v533_v31  ;;  %v287_v36 = vsub.f32 0.0, %v1149_v27  ;;  %v288_v37 = vsub.f32 0.0, %v1151_v28  ;;  %v482_v40 = vld [vmem:[%s1377_s1 + $0x48] sm:$0xff]  ;;  %v516_v41 = vld [vmem:[%s1377_s1 + $0x158] sm:$0xff]  ;;  %903 = vmatprep.subr.mxu0 %v499_v30  ;;  %v531_v44 = vld [vmem:[%s1377_s1 + $0x1d0] sm:$0xff]  ;;  %v366_v30 = vunpack.c.l.s4 %v1038_v26  ;;  %v368_v31 = vlaneseq }
  0x17   : > { %935 = vmatpush3.msra.mxu1 %v517_v34  ;;  %v290_v42 = vsub.f32 0.0, %v1161_v32  ;;  %v515_v45 = vld [vmem:[%s1377_s1 + $0x150] sm:$0xff]  ;;  %v295_v48 = vmul.f32 1.442695, %v289_v38  ;;  %904 = vmatpush3.msra.mxu0 %v483_v33  ;;  %v481_v50 = vld [vmem:[%s1377_s1 + $0x40] sm:$0xff]  ;;  %v530_v51 = vld [vmem:[%s1377_s1 + $0x1c8] sm:$0xff] }
  0x18   : > { %936 = vmatprep.subr.mxu1 %v532_v35  ;;  %v291_v46 = vmul.f32 1.442695, %v287_v36  ;;  %v293_v47 = vmul.f32 1.442695, %v288_v37  ;;  %905 = vmatprep.subr.mxu0 %v498_v39  ;;  %v496_v52 = vld [vmem:[%s1377_s1 + $0xb8] sm:$0xff]  ;;  %v514_v53 = vld [vmem:[%s1377_s1 + $0x148] sm:$0xff]  ;;  %v367_v36 = vunpack.c.0.s8 %v366_v30 }
  0x19   : > { %937 = vmatpush3.msra.mxu1 %v516_v41  ;;  %v297_v49 = vmul.f32 1.442695, %v290_v42  ;;  %906 = vmatpush3.msra.mxu0 %v482_v40  ;;  %v529_v54 = vld [vmem:[%s1377_s1 + $0x1c0] sm:$0xff]  ;;  %v480_v55 = vld [vmem:[%s1377_s1 + $0x38] sm:$0xff]  ;;  %v495_v57 = vld [vmem:[%s1377_s1 + $0xb0] sm:$0xff]  ;;  %v369_v37 = vshrl.u32 %v368_v31, 7 }
  0x1a   : > { %938 = vmatprep.subr.mxu1 %v531_v44  ;;  %1013 = vpow2.f32 %v291_v46  ;;  %907 = vmatprep.subr.mxu0 %v497_v43  ;;  %v513_v56 = vld [vmem:[%s1377_s1 + $0x140] sm:$0xff]  ;;  %v528_v58 = vld [vmem:[%s1377_s1 + $0x1b8] sm:$0xff]  ;;  %v479_v59 = vld [vmem:[%s1377_s1 + $0x30] sm:$0xff] }
  0x1b   : > { %939 = vmatpush3.msra.mxu1 %v515_v45  ;;  %1015 = vpow2.f32 %v293_v47  ;;  %908 = vmatpush3.msra.mxu0 %v481_v50  ;;  %v512_v60 = vld [vmem:[%s1377_s1 + $0x138] sm:$0xff]  ;;  %v494_v61 = vld [vmem:[%s1377_s1 + $0xa8] sm:$0xff]  ;;  %v527_v62 = vld [vmem:[%s1377_s1 + $0x1b0] sm:$0xff]  ;;  %v1305_v44 = vsub.s32 %v367_v36, %v369_v37 }
  0x1c   : > { %940 = vmatprep.subr.mxu1 %v530_v51  ;;  %1017 = vpow2.f32 %v295_v48  ;;  %909 = vmatprep.subr.mxu0 %v496_v52  ;;  %v478_v63 = vld [vmem:[%s1377_s1 + $0x28] sm:$0xff]  ;;  %v511_v0 = vld [vmem:[%s1377_s1 + $0x130] sm:$0xff]  ;;  %v493_v2 = vld [vmem:[%s1377_s1 + $0xa0] sm:$0xff] }
  0x1d   : > { %941 = vmatpush3.msra.mxu1 %v514_v53  ;;  %1019 = vpow2.f32 %v297_v49  ;;  %910 = vmatpush3.msra.mxu0 %v480_v55  ;;  %v526_v3 = vld [vmem:[%s1377_s1 + $0x1a8] sm:$0xff]  ;;  %v477_v4 = vld [vmem:[%s1377_s1 + $0x20] sm:$0xff]  ;;  %v492_v6 = vld [vmem:[%s1377_s1 + $0x98] sm:$0xff] }
  0x1e   : > { %942 = vmatprep.subr.mxu1 %v529_v54  ;;  %911 = vmatprep.subr.mxu0 %v495_v57  ;;  %v510_v5 = vld [vmem:[%s1377_s1 + $0x128] sm:$0xff]  ;;  %v525_v7 = vld [vmem:[%s1377_s1 + $0x1a0] sm:$0xff]  ;;  %v476_v8 = vld [vmem:[%s1377_s1 + $0x18] sm:$0xff] }
  0x1f   : > { %943 = vmatpush3.msra.mxu1 %v513_v56  ;;  %912 = vmatpush3.msra.mxu0 %v479_v59  ;;  %v509_v9 = vld [vmem:[%s1377_s1 + $0x120] sm:$0xff]  ;;  %v491_v10 = vld [vmem:[%s1377_s1 + $0x90] sm:$0xff]  ;;  %v490_v12 = vld [vmem:[%s1377_s1 + $0x88] sm:$0xff] }
  0x20   : > { %944 = vmatprep.subr.mxu1 %v528_v58  ;;  %913 = vmatprep.subr.mxu0 %v494_v61  ;;  %v475_v11 = vld [vmem:[%s1377_s1 + $0x10] sm:$0xff]  ;;  %v473_v38 = vld [vmem:[%s1377_s1] sm:$0xff]  ;;  %v522_v42 = vld [vmem:[%s1377_s1 + $0x188] sm:$0xff] }
  0x21   : > { %945 = vmatpush3.msra.mxu1 %v512_v60  ;;  %914 = vmatpush3.msra.mxu0 %v478_v63  ;;  %v523_v39 = vld [vmem:[%s1377_s1 + $0x190] sm:$0xff]  ;;  %v332_v41 = vld [vmem:[#allocation2 + $0x1] ss:$2 sm:$0x3]  ;;  %v506_v56 = vld [vmem:[%s1377_s1 + $0x108] sm:$0xff] }
  0x22   : > { %946 = vmatprep.subr.mxu1 %v527_v62  ;;  %915 = vmatprep.subr.mxu0 %v493_v2  ;;  %v507_v40 = vld [vmem:[%s1377_s1 + $0x110] sm:$0xff]  ;;  %v521_v57 = vld [vmem:[%s1377_s1 + $0x180] sm:$0xff] }
  0x23   : > { %947 = vmatpush3.msra.mxu1 %v511_v0  ;;  %916 = vmatpush3.msra.mxu0 %v477_v4  ;;  %v505_v60 = vld [vmem:[%s1377_s1 + $0x100] sm:$0xff]  ;;  %v543_v26 = vld [vmem:[%s1377_s1 + $0x230] sm:$0xff] }
  0x24   : > { %948 = vmatprep.subr.mxu1 %v526_v3  ;;  %917 = vmatprep.subr.mxu0 %v492_v6  ;;  %v336_v0 = vld [vmem:[#allocation2 + $0x2] ss:$2 sm:$0x3]  ;;  %v539_v36 = vld [vmem:[%s1377_s1 + $0x210] sm:$0xff] }
  0x25   : > { %949 = vmatpush3.msra.mxu1 %v510_v5  ;;  %918 = vmatpush3.msra.mxu0 %v476_v8  ;;  %v328_v2 = vld [vmem:[#allocation2] ss:$2 sm:$0x3] }
  0x26   : > { %950 = vmatprep.subr.mxu1 %v525_v7  ;;  %919 = vmatprep.subr.mxu0 %v491_v10 }
  0x27   : > { %951 = vmatpush3.msra.mxu1 %v509_v9  ;;  %v1014_v13 = vpop.eup %1013  ;;  %920 = vmatpush3.msra.mxu0 %v475_v11 }
  0x28   : > { %v1016_v14 = vpop.eup %1015  ;;  %v299_v15 = vadd.f32 1.0, %v1014_v13  ;;  %921 = vmatprep.subr.mxu0 %v490_v12 }
  0x29   : > { %v1018_v16 = vpop.eup %1017  ;;  %v300_v17 = vadd.f32 1.0, %v1016_v14 }
  0x2a   : > { %v1020_v18 = vpop.eup %1019  ;;  %v301_v19 = vadd.f32 1.0, %v1018_v16  ;;  %1021 = vrcp.f32 %v299_v15 }
  0x2b   : > { %1023 = vrcp.f32 %v300_v17  ;;  %v302_v20 = vadd.f32 1.0, %v1020_v18 }
  0x2c   : > { %1025 = vrcp.f32 %v301_v19 }
  0x2d   : > { %1027 = vrcp.f32 %v302_v20 }
  0x37   : > { %v1022_v21 = vpop.eup %1021 }
  0x38   : > { %v1024_v22 = vpop.eup %1023  ;;  %v311_v23 = vmul.f32 %v1022_v21, %v1149_v27  ;;  %v474_v27 = vld [vmem:[%s1377_s1 + $0x8] sm:$0xff]  ;;  %v544_v21 = vld [vmem:[%s1377_s1 + $0x238] sm:$0xff] }
  0x39   : > { %v1026_v24 = vpop.eup %1025  ;;  %v312_v25 = vmul.f32 %v1024_v22, %v1151_v28  ;;  %v524_v28 = vld [vmem:[%s1377_s1 + $0x198] sm:$0xff]  ;;  %922 = vmatpush3.msra.mxu0 %v474_v27 }
  0x3a   : > { %v1028_v33 = vpop.eup %1027  ;;  %v313_v34 = vmul.f32 %v1026_v24, %v1153_v29  ;;  %324 = vst.msk [vmem:[#allocation2 + $0x9] sm:$0xf] %vm323_vm1, %v311_v23  ;;  %952 = vmatprep.subr.mxu1 %v524_v28  ;;  %v489_v29 = vld [vmem:[%s1377_s1 + $0x80] sm:$0xff]  ;;  %v540_v28 = vld [vmem:[%s1377_s1 + $0x218] sm:$0xff] }
  0x3b   : > { %325 = vst.msk [vmem:[#allocation2 + $0x11] sm:$0xf] %vm323_vm1, %v312_v25  ;;  %v314_v35 = vmul.f32 %v1028_v33, %v1161_v32  ;;  %v508_v32 = vld [vmem:[%s1377_s1 + $0x118] sm:$0xff]  ;;  %923 = vmatprep.subr.mxu0 %v489_v29  ;;  %v542_v33 = vld [vmem:[%s1377_s1 + $0x228] sm:$0xff] }
  0x3c   : > { %326 = vst.msk [vmem:[#allocation2 + $0x19] sm:$0xf] %vm323_vm1, %v313_v34  ;;  %953 = vmatpush3.msra.mxu1 %v508_v32  ;;  %924 = vmatpush3.msra.mxu0 %v473_v38  ;;  %v541_v34 = vld [vmem:[%s1377_s1 + $0x220] sm:$0xff]  ;;  %v538_v29 = vld [vmem:[%s1377_s1 + $0x208] sm:$0xff] }
  0x3d   : > { %327 = vst.msk [vmem:[#allocation2 + $0x21] sm:$0xf] %vm323_vm1, %v314_v35  ;;  %954 = vmatprep.subr.mxu1 %v523_v39  ;;  %972 = vmatprep.subr.mxu0 %v1037_v1  ;;  %v537_v32 = vld [vmem:[%s1377_s1 + $0x200] sm:$0xff] }
  0x3e   : > { %955 = vmatpush3.msra.mxu1 %v507_v40 }
  0x3f   : > { %956 = vmatprep.subr.mxu1 %v522_v42 }
  0x40   : > { %957 = vmatpush3.msra.mxu1 %v506_v56 }
  0x41   : > { %v339_v43 = vld [vmem:[#allocation2 + $0x8] ss:$2 sm:$0x3]  ;;  %958 = vmatprep.subr.mxu1 %v521_v57  ;;  %v343_v9 = vld [vmem:[#allocation2 + $0x9] ss:$2 sm:$0x3] }
  0x42   : > { %v347_v45 = vld [vmem:[#allocation2 + $0xa] ss:$2 sm:$0x3]  ;;  %v334_v46 = vld [vmem:[#allocation2 + $0x11] ss:$2 sm:$0x3]  ;;  %959 = vmatpush3.msra.mxu1 %v505_v60 }
  0x43   : > { %v355_v47 = vld [vmem:[#allocation2 + $0x11] ss:$2 sm:$0x3]  ;;  %v341_v48 = vld [vmem:[#allocation2 + $0x18] ss:$2 sm:$0x3]  ;;  %v375_v49 = vcombine.low %v332_v41, %v334_v46 }
  0x44   : > { %v349_v50 = vld [vmem:[#allocation2 + $0x1a] ss:$2 sm:$0x3]  ;;  %v399_v51 = vcombine.low %v339_v43, %v341_v48  ;;  %v357_v52 = vld [vmem:[#allocation2 + $0x21] ss:$2 sm:$0x3] }
  0x45   : > { %v423_v53 = vcombine.low %v347_v45, %v349_v50  ;;  %v382_v54 = vrot.slane %v375_v49, %v1305_v44  ;;  %v447_v55 = vcombine.low %v355_v47, %v357_v52  ;;  %v338_v3 = vld [vmem:[#allocation2 + $0x12] ss:$2 sm:$0x3]  ;;  %v353_v8 = vld [vmem:[#allocation2 + $0x20] ss:$2 sm:$0x3] }
  0x46   : > { %v406_v58 = vrot.slane %v399_v51, %v1305_v44  ;;  %v330_v4 = vld [vmem:[#allocation2 + $0x10] ss:$2 sm:$0x3]  ;;  %v388_v5 = vcombine.low %v336_v0, %v338_v3  ;;  %v345_v10 = vld [vmem:[#allocation2 + $0x19] ss:$2 sm:$0x3] }
  0x47   : > { %v430_v59 = vrot.slane %v423_v53, %v1305_v44  ;;  %v454_v61 = vrot.slane %v447_v55, %v1305_v44  ;;  %v364_v6 = vcombine.low %v328_v2, %v330_v4  ;;  %v351_v7 = vld [vmem:[#allocation2 + $0x10] ss:$2 sm:$0x3]  ;;  %v412_v14 = vcombine.low %v343_v9, %v345_v10  ;;  %v361_v27 = vld [vmem:[#allocation2 + $0x22] ss:$2 sm:$0x3] }
  0x48   : > { %v1003_v62 = vpack.i.bf16 %v382_v54, %v406_v58  ;;  %v436_v11 = vcombine.low %v351_v7, %v353_v8  ;;  %v395_v12 = vrot.slane %v388_v5, %v1305_v44  ;;  %v359_v35 = vld [vmem:[#allocation2 + $0x12] ss:$2 sm:$0x3]  ;;  %v888_v45 = vld [vmem:[%s1378_s2] ss:$0 sm:$0xff] }
  0x49   : > { %v1008_v63 = vpack.i.bf16 %v430_v59, %v454_v61  ;;  %v371_v13 = vrot.slane %v364_v6, %v1305_v44  ;;  %v419_v22 = vrot.slane %v412_v14, %v1305_v44  ;;  %v460_v37 = vcombine.low %v359_v35, %v361_v27 }
  0x4a   : > { %1004 = vrot.lane.b32.xlu0 %v1003_v62, %s1039_s27  ;;  %v443_v18 = vrot.slane %v436_v11, %v1305_v44 }
  0x4b   : > { %v467_v38 = vrot.slane %v460_v37, %v1305_v44 }
  0x4e   : > { %1009 = vrot.lane.b32.xlu0 %v1008_v63, %s1039_s27  ;;  %s256_s27 = scalar_lea.vmem %s1381_s5, %s884_s24 }
  0xbc   : > { %v1005_v15 = vpop.permute.xlu0 %1004 }
  0xbd   : > { %v1007_v16 = vunpack.i.h.bf16 %v1005_v15  ;;  %v1006_v17 = vunpack.i.l.bf16 %v1005_v15 }
  0xbf   : > { %v470_v19 = vsel %vm468_vm2, %v395_v12, %v1006_v17  ;;  %v469_v20 = vsel %vm468_vm2, %v371_v13, %v1007_v16 }
  0xc0   : > { %v1010_v23 = vpop.permute.xlu0 %1009  ;;  %618 = vmatprep.mubr.f32.mxu0 %v470_v19 }
  0xc1   : > { %v1012_v24 = vunpack.i.h.bf16 %v1010_v23  ;;  %v1011_v25 = vunpack.i.l.bf16 %v1010_v23  ;;  %619 = vmatmul.mubr.f32.vlgmr.msra.gmra.mxu0 %v469_v20 }
  0xc2   : > { %973 = vmatpush3.msra.mxu0 %v544_v21  ;;  %988 = vmatprep.mubr.msk.f32.mxu0 %vm1040_vm3, %v1037_v1 }
  0xc3   : > { %974 = vmatprep.subr.mxu0 %v1037_v1  ;;  %v472_v30 = vsel %vm468_vm2, %v443_v18, %v1011_v25  ;;  %v471_v31 = vsel %vm468_vm2, %v419_v22, %v1012_v24 }
  0xc4   : > { %975 = vmatpush3.msra.mxu0 %v543_v26  ;;  %688 = vmatprep.mubr.f32.mxu1 %v472_v30 }
  0xc5   : > { %976 = vmatprep.subr.mxu0 %v1037_v1  ;;  %689 = vmatmul.mubr.f32.vlgmr.msra.gmra.mxu1 %v471_v31 }
  0xc6   : > { %977 = vmatpush3.msra.mxu0 %v542_v33 }
  0xc7   : > { %978 = vmatprep.subr.mxu0 %v1037_v1 }
  0xc8   : > { %979 = vmatpush3.msra.mxu0 %v541_v34 }
  0xc9   : > { %980 = vmatprep.subr.mxu0 %v1037_v1 }
  0xca   : > { %981 = vmatpush3.msra.mxu0 %v540_v28 }
  0xcb   : > { %982 = vmatprep.subr.mxu0 %v1037_v1 }
  0xcc   : > { %983 = vmatpush3.msra.mxu0 %v539_v36 }
  0xcd   : > { %984 = vmatprep.subr.mxu0 %v1037_v1 }
  0xce   : > { %985 = vmatpush3.msra.mxu0 %v538_v29 }
  0xcf   : > { %986 = vmatprep.subr.mxu0 %v1037_v1 }
  0xd0   : > { %987 = vmatpush3.msra.mxu0 %v537_v32 }
  0xd1   : > { %989 = vmatmul.mubr.msk.f32.vlgmr.msra.gmra.mxu0 %vm468_vm2, %v467_v38 }
 0x181   : > { %v925_v39 = vpop.f32.mrf.mxu0 }
 0x183   : > { %v926_v41 = vpop.f32.mrf.mxu0 }
 0x184   : > { %v927_v43 = vadd.f32 %v926_v41, %v925_v39 }
 0x185   : > { %v960_v40 = vpop.f32.mrf.mxu1 }
 0x186   : > { %v621_v47 = vadd.f32 %v927_v43, %v888_v45 }
 0x187   : > { %v961_v42 = vpop.f32.mrf.mxu1 }
 0x188   : > { %v962_v46 = vadd.f32 %v961_v42, %v960_v40 }
 0x18a   : > { %v691_v44 = vadd.f32 %v962_v46, %v621_v47 }
 0x191   : > { %v760_v1 = vpop.f32.mrf.mxu0 }
 0x192   : > { %v761_v48 = vadd.f32 %v760_v1, %v691_v44 }
 0x193   : > { %v990_v49 = vpop.f32.mrf.mxu0 }
 0x194   : > { %764 = vst [vmem:[%s256_s27] sm:$0xf] %v761_v48  ;;  %v766_v50 = vsel %vm765_vm4, %v761_v48, 0.0  ;;  %v774_v51 = vmul.f32 %v761_v48, %v761_v48 }
 0x195   : > { %v767_v52 = vrot.slane %v766_v50, 4 }
 0x196   : > { %v775_v53 = vsel %vm765_vm4, %v774_v51, 0.0 }
 0x197   : > { %v768_v54 = vadd.f32 %v767_v52, %v766_v50  ;;  %v776_v55 = vrot.slane %v775_v53, 4 }
 0x199   : > { %v769_v56 = vrot.slane %v768_v54, 2  ;;  %v777_v57 = vadd.f32 %v776_v55, %v775_v53 }
 0x19b   : > { %v770_v58 = vadd.f32 %v769_v56, %v768_v54  ;;  %v778_v59 = vrot.slane %v777_v57, 2 }
 0x19d   : > { %v771_v60 = vrot.slane %v770_v58, 1  ;;  %v779_v61 = vadd.f32 %v778_v59, %v777_v57 }
 0x19f   : > { %v772_v62 = vadd.f32 %v771_v60, %v770_v58  ;;  %v780_v63 = vrot.slane %v779_v61, 1 }
 0x1a1   : > { %773 = vst [vmem:[%s260_s7] sm:$0x1] %v772_v62  ;;  %v781_v0 = vadd.f32 %v780_v63, %v779_v61 }
 0x1a3   : > { %782 = vst [vmem:[%s260_s7 + $0x1] sm:$0x1] %v781_v0 }
 0x1a4 PF: > { %s17_s21 = sadd.s32 1, %s1035_s21  }
 0x1a5   : > { %p14_p4 = scmp.ge.s32.totalorder %s17_s21, 4  }
 0x1a7   :  { %16 = sbr.rel (!%p14_p4) target bundleno = 1 (0x1), region = 99 }

</bundles_post_ra>
